<compile_context>
chip_gen: v7x
topology: tpu7x:2x2x1
jax: 0.10.0
libtpu: 0.0.40
codegen_flags: <defaults>
</compile_context>

<pallas_src>
import jax
import jax.numpy as jnp
from jax.experimental import pallas as pl
from jax.experimental.pallas import tpu as pltpu


def _crb_kernel(xp_ref, cond_ref,
                w1_ref, b1_ref, g1_ref, be1_ref,
                fw_ref, fb_ref,
                w2_ref, b2_ref, g2_ref, be2_ref,
                wres_ref, bres_ref,
                gmat_ref, gmatT_ref,
                o_ref, pad_ref):
    f32 = jnp.float32
    T = o_ref.shape[1]
    C_out = o_ref.shape[2]
    G = gmat_ref.shape[1]
    n_per_group = jnp.float32(T * (C_out // G))
    eps = jnp.float32(1e-5)

    gmat = gmat_ref[...]      # (C_out, G) one-hot group membership
    gmatT = gmatT_ref[...]    # (G, C_out)

    def group_norm(h, gamma, beta):
        # per-group stats over (T, channels-in-group) via tiny matmuls (no lane reshapes)
        s_c = jnp.sum(h, axis=0, keepdims=True)          # (1, C)
        sq_c = jnp.sum(h * h, axis=0, keepdims=True)     # (1, C)
        mean_g = jnp.dot(s_c, gmat, preferred_element_type=f32) / n_per_group   # (1, G)
        ex2_g = jnp.dot(sq_c, gmat, preferred_element_type=f32) / n_per_group   # (1, G)
        var_g = ex2_g - mean_g * mean_g
        inv_g = jax.lax.rsqrt(var_g + eps)
        mean_c = jnp.dot(mean_g, gmatT, preferred_element_type=f32)             # (1, C)
        inv_c = jnp.dot(inv_g, gmatT, preferred_element_type=f32)               # (1, C)
        return (h - mean_c) * inv_c * gamma + beta

    def mish(v):
        # numerically stable softplus; exp/log/tanh go to the EUP
        sp = jnp.maximum(v, 0.0) + jnp.log(1.0 + jnp.exp(-jnp.abs(v)))
        return v * jnp.tanh(sp)

    xp = xp_ref[0]                                       # (T+2, C_in), already zero-padded in T

    # ---- conv1 (k=3, pad=1): three shifted MXU matmuls, f32 accumulation ----
    h = (jnp.dot(xp[0:T, :],       w1_ref[0], preferred_element_type=f32)
         + jnp.dot(xp[1:T + 1, :], w1_ref[1], preferred_element_type=f32)
         + jnp.dot(xp[2:T + 2, :], w1_ref[2], preferred_element_type=f32)
         + b1_ref[...])                                  # (T, C_out)

    h = mish(group_norm(h, g1_ref[...], be1_ref[...]))

    # ---- FiLM: per-channel scale & shift from the conditioning vector ----
    mod = jnp.dot(cond_ref[0], fw_ref[...], preferred_element_type=f32) + fb_ref[...]  # (1, 2*C_out)
    scale = mod[:, :C_out]
    shift = mod[:, C_out:]
    h = h * scale + shift

    # ---- conv2 (k=3, pad=1): zero-pad in a VMEM scratch, three shifted matmuls ----
    zrow = jnp.zeros((1, C_out), f32)
    pad_ref[0:1, :] = zrow
    pad_ref[T + 1:T + 2, :] = zrow
    pad_ref[1:T + 1, :] = h
    h2 = (jnp.dot(pad_ref[0:T, :],       w2_ref[0], preferred_element_type=f32)
          + jnp.dot(pad_ref[1:T + 1, :], w2_ref[1], preferred_element_type=f32)
          + jnp.dot(pad_ref[2:T + 2, :], w2_ref[2], preferred_element_type=f32)
          + b2_ref[...])                                 # (T, C_out)

    h2 = mish(group_norm(h2, g2_ref[...], be2_ref[...]))

    # ---- residual 1x1 conv + add (lane-dense store: last dim is C_out) ----
    res = jnp.dot(xp[1:T + 1, :], wres_ref[...], preferred_element_type=f32) + bres_ref[...]
    o_ref[0] = (h2 + res).astype(o_ref.dtype)


def conditional_residual_block1d(x, cond, params, *, n_groups=8):
    """Forward pass of ConditionalResidualBlock1D.

    Args:
      x:      (B, C_in, T) float32   (PyTorch NCL layout)
      cond:   (B, cond_dim) float32
      params: dict with PyTorch-layout parameters:
        conv1_w (C_out, C_in, 3), conv1_b (C_out,)
        gn1_w, gn1_b (C_out,)
        film_w (2*C_out, cond_dim), film_b (2*C_out,)
        conv2_w (C_out, C_out, 3), conv2_b (C_out,)
        gn2_w, gn2_b (C_out,)
        res_w (C_out, C_in, 1) or None, res_b (C_out,) or None
    Returns:
      (B, C_out, T) float32
    """
    f32 = jnp.float32
    B, C_in, T = x.shape
    C_out, _, K = params["conv1_w"].shape
    assert K == 3, "kernel implements kernel_size=3, padding=1"
    G = n_groups
    assert C_out % G == 0
    cond_dim = cond.shape[1]

    # ---- layout glue (a channels-last model would elide these transposes) ----
    x_nlc = jnp.transpose(x, (0, 2, 1)).astype(f32)            # (B, T, C_in)
    xp = jnp.pad(x_nlc, ((0, 0), (1, 1), (0, 0)))              # (B, T+2, C_in)
    cond3 = cond.reshape(B, 1, cond_dim).astype(f32)           # (B, 1, cond_dim)

    # ---- parameters in matmul-friendly, channels-last layout (tiny, VMEM-resident) ----
    w1 = jnp.transpose(params["conv1_w"], (2, 1, 0)).astype(f32)   # (K, C_in, C_out)
    b1 = params["conv1_b"].reshape(1, C_out).astype(f32)
    g1 = params["gn1_w"].reshape(1, C_out).astype(f32)
    be1 = params["gn1_b"].reshape(1, C_out).astype(f32)
    fw = jnp.transpose(params["film_w"]).astype(f32)               # (cond_dim, 2*C_out)
    fb = params["film_b"].reshape(1, 2 * C_out).astype(f32)
    w2 = jnp.transpose(params["conv2_w"], (2, 1, 0)).astype(f32)   # (K, C_out, C_out)
    b2 = params["conv2_b"].reshape(1, C_out).astype(f32)
    g2 = params["gn2_w"].reshape(1, C_out).astype(f32)
    be2 = params["gn2_b"].reshape(1, C_out).astype(f32)
    if params.get("res_w") is not None:
        wres = jnp.transpose(params["res_w"][:, :, 0]).astype(f32)  # (C_in, C_out)
        bres = params["res_b"].reshape(1, C_out).astype(f32)
    else:
        assert C_in == C_out
        wres = jnp.eye(C_out, dtype=f32)
        bres = jnp.zeros((1, C_out), f32)
    gmat = (jnp.arange(C_out)[:, None] // (C_out // G)
            == jnp.arange(G)[None, :]).astype(f32)                 # (C_out, G)
    gmatT = jnp.transpose(gmat)                                    # (G, C_out)

    # ---- advisory cost estimate (helps XLA schedule around the custom call) ----
    flops = B * (2 * T * K * C_in * C_out          # conv1
                 + 2 * T * K * C_out * C_out       # conv2
                 + 2 * T * C_in * C_out            # residual 1x1
                 + 2 * cond_dim * 2 * C_out)       # FiLM fc
    transcendentals = B * (2 * 3 * T * C_out + 2 * G)
    operands = (xp, cond3, w1, b1, g1, be1, fw, fb, w2, b2, g2, be2, wres, bres, gmat, gmatT)
    bytes_accessed = 4 * (sum(int(a.size) for a in operands) + B * T * C_out)

    wmap2 = lambda b: (0, 0)
    wmap3 = lambda b: (0, 0, 0)

    out_nlc = pl.pallas_call(
        _crb_kernel,
        out_shape=jax.ShapeDtypeStruct((B, T, C_out), x.dtype),
        grid_spec=pltpu.PrefetchScalarGridSpec(
            num_scalar_prefetch=0,
            grid=(B,),
            in_specs=[
                pl.BlockSpec((1, T + 2, C_in), lambda b: (b, 0, 0)),   # xp (per-batch tile)
                pl.BlockSpec((1, 1, cond_dim), lambda b: (b, 0, 0)),   # cond (per-batch tile)
                pl.BlockSpec((K, C_in, C_out), wmap3),                 # conv1 weight (resident)
                pl.BlockSpec((1, C_out), wmap2),                       # conv1 bias
                pl.BlockSpec((1, C_out), wmap2),                       # gn1 gamma
                pl.BlockSpec((1, C_out), wmap2),                       # gn1 beta
                pl.BlockSpec((cond_dim, 2 * C_out), wmap2),            # FiLM weight
                pl.BlockSpec((1, 2 * C_out), wmap2),                   # FiLM bias
                pl.BlockSpec((K, C_out, C_out), wmap3),                # conv2 weight
                pl.BlockSpec((1, C_out), wmap2),                       # conv2 bias
                pl.BlockSpec((1, C_out), wmap2),                       # gn2 gamma
                pl.BlockSpec((1, C_out), wmap2),                       # gn2 beta
                pl.BlockSpec((C_in, C_out), wmap2),                    # residual 1x1 weight
                pl.BlockSpec((1, C_out), wmap2),                       # residual bias
                pl.BlockSpec((C_out, G), wmap2),                       # group one-hot
                pl.BlockSpec((G, C_out), wmap2),                       # group one-hot (transposed)
            ],
            out_specs=pl.BlockSpec((1, T, C_out), lambda b: (b, 0, 0)),
            scratch_shapes=[pltpu.VMEM((T + 2, C_out), jnp.float32)],  # conv2 padding buffer
        ),
        compiler_params=pltpu.CompilerParams(
            dimension_semantics=("parallel",)),                        # v7x: 2 TCs split batch
        cost_estimate=pl.CostEstimate(
            flops=flops, transcendentals=transcendentals, bytes_accessed=bytes_accessed),
    )(xp, cond3, w1, b1, g1, be1, fw, fb, w2, b2, g2, be2, wres, bres, gmat, gmatT)

    return jnp.transpose(out_nlc, (0, 2, 1))   # back to PyTorch NCL


# ----------------------------- pure-JAX reference ------------------------------
def _reference(x, cond, p, n_groups):
    def conv1d(h, w, b, pad):
        out = jax.lax.conv_general_dilated(
            h, w, window_strides=(1,), padding=((pad, pad),),
            dimension_numbers=("NCH", "OIH", "NCH"))
        return out + b[None, :, None]

    def group_norm(h, gamma, beta, G, eps=1e-5):
        B, C, T = h.shape
        hg = h.reshape(B, G, C // G, T)
        mean = hg.mean(axis=(2, 3), keepdims=True)
        var = ((hg - mean) ** 2).mean(axis=(2, 3), keepdims=True)
        hg = (hg - mean) / jnp.sqrt(var + eps)
        return hg.reshape(B, C, T) * gamma[None, :, None] + beta[None, :, None]

    def mish(v):
        return v * jnp.tanh(jax.nn.softplus(v))

    C = p["conv1_w"].shape[0]
    h = conv1d(x, p["conv1_w"], p["conv1_b"], 1)
    h = mish(group_norm(h, p["gn1_w"], p["gn1_b"], n_groups))
    mod = cond @ p["film_w"].T + p["film_b"]
    scale, shift = mod[:, :C], mod[:, C:]
    h = h * scale[:, :, None] + shift[:, :, None]
    h = conv1d(h, p["conv2_w"], p["conv2_b"], 1)
    h = mish(group_norm(h, p["gn2_w"], p["gn2_b"], n_groups))
    res = jnp.einsum("oc,bct->bot", p["res_w"][:, :, 0], x) + p["res_b"][None, :, None]
    return h + res


if __name__ == "__main__":
    # Small but lane-friendly shapes: C_out=128 makes the output last dim a full lane width.
    B, C_in, C_out, T, cond_dim, n_groups = 2, 64, 128, 32, 32, 8

    key = jax.random.PRNGKey(0)
    ks = jax.random.split(key, 16)

    def uni(k, shape, fan_in):
        b = 1.0 / jnp.sqrt(jnp.float32(fan_in))
        return jax.random.uniform(k, shape, jnp.float32, minval=-b, maxval=b)

    x = jax.random.normal(ks[0], (B, C_in, T), dtype=jnp.float32)
    cond = jax.random.normal(ks[1], (B, cond_dim), dtype=jnp.float32)

    params = dict(
        conv1_w=uni(ks[2], (C_out, C_in, 3), C_in * 3),
        conv1_b=uni(ks[3], (C_out,), C_in * 3),
        gn1_w=1.0 + 0.1 * jax.random.normal(ks[4], (C_out,), dtype=jnp.float32),
        gn1_b=0.1 * jax.random.normal(ks[5], (C_out,), dtype=jnp.float32),
        film_w=uni(ks[6], (2 * C_out, cond_dim), cond_dim),
        film_b=uni(ks[7], (2 * C_out,), cond_dim),
        conv2_w=uni(ks[8], (C_out, C_out, 3), C_out * 3),
        conv2_b=uni(ks[9], (C_out,), C_out * 3),
        gn2_w=1.0 + 0.1 * jax.random.normal(ks[10], (C_out,), dtype=jnp.float32),
        gn2_b=0.1 * jax.random.normal(ks[11], (C_out,), dtype=jnp.float32),
        res_w=uni(ks[12], (C_out, C_in, 1), C_in),
        res_b=uni(ks[13], (C_out,), C_in),
    )

    out = conditional_residual_block1d(x, cond, params, n_groups=n_groups)
    out = jax.block_until_ready(out)

    ref = jax.block_until_ready(_reference(x, cond, params, n_groups))
    assert out.shape == (B, C_out, T), out.shape
    max_err = float(jnp.max(jnp.abs(out - ref)))
    assert max_err < 2e-3, f"mismatch vs reference, max abs err = {max_err}"

    print("KERNEL_OK")
</pallas_src>

<mosaic_0001>
module attributes {stable_mosaic.version = 11 : i64} {
  func.func @_crb_kernel(%arg0: i32, %arg1: memref<1x34x64xf32, #tpu.memory_space<vmem>>, %arg2: memref<1x1x32xf32, #tpu.memory_space<vmem>>, %arg3: memref<3x64x128xf32, #tpu.memory_space<vmem>>, %arg4: memref<1x128xf32, #tpu.memory_space<vmem>>, %arg5: memref<1x128xf32, #tpu.memory_space<vmem>>, %arg6: memref<1x128xf32, #tpu.memory_space<vmem>>, %arg7: memref<32x256xf32, #tpu.memory_space<vmem>>, %arg8: memref<1x256xf32, #tpu.memory_space<vmem>>, %arg9: memref<3x128x128xf32, #tpu.memory_space<vmem>>, %arg10: memref<1x128xf32, #tpu.memory_space<vmem>>, %arg11: memref<1x128xf32, #tpu.memory_space<vmem>>, %arg12: memref<1x128xf32, #tpu.memory_space<vmem>>, %arg13: memref<64x128xf32, #tpu.memory_space<vmem>>, %arg14: memref<1x128xf32, #tpu.memory_space<vmem>>, %arg15: memref<128x8xf32, #tpu.memory_space<vmem>>, %arg16: memref<8x128xf32, #tpu.memory_space<vmem>>, %arg17: memref<1x32x128xf32, #tpu.memory_space<vmem>>, %arg18: memref<34x128xf32, #tpu.memory_space<vmem>>) attributes {dimension_semantics = [#tpu.dimension_semantics<parallel>], iteration_bounds = array<i64: 2>, scalar_prefetch = 0 : i64, scratch_operands = 1 : i64, tpu.core_type = #tpu.core_type<tc>, window_params = [{transform_indices = @transform_0, window_bounds = array<i64: 1, 34, 64>}, {transform_indices = @transform_1, window_bounds = array<i64: 1, 1, 32>}, {pipeline_mode = #tpu.pipeline_mode<synchronous>, transform_indices = @transform_2, window_bounds = array<i64: 3, 64, 128>}, {pipeline_mode = #tpu.pipeline_mode<synchronous>, transform_indices = @transform_3, window_bounds = array<i64: 1, 128>}, {pipeline_mode = #tpu.pipeline_mode<synchronous>, transform_indices = @transform_4, window_bounds = array<i64: 1, 128>}, {pipeline_mode = #tpu.pipeline_mode<synchronous>, transform_indices = @transform_5, window_bounds = array<i64: 1, 128>}, {pipeline_mode = #tpu.pipeline_mode<synchronous>, transform_indices = @transform_6, window_bounds = array<i64: 32, 256>}, {pipeline_mode = #tpu.pipeline_mode<synchronous>, transform_indices = @transform_7, window_bounds = array<i64: 1, 256>}, {pipeline_mode = #tpu.pipeline_mode<synchronous>, transform_indices = @transform_8, window_bounds = array<i64: 3, 128, 128>}, {pipeline_mode = #tpu.pipeline_mode<synchronous>, transform_indices = @transform_9, window_bounds = array<i64: 1, 128>}, {pipeline_mode = #tpu.pipeline_mode<synchronous>, transform_indices = @transform_10, window_bounds = array<i64: 1, 128>}, {pipeline_mode = #tpu.pipeline_mode<synchronous>, transform_indices = @transform_11, window_bounds = array<i64: 1, 128>}, {pipeline_mode = #tpu.pipeline_mode<synchronous>, transform_indices = @transform_12, window_bounds = array<i64: 64, 128>}, {pipeline_mode = #tpu.pipeline_mode<synchronous>, transform_indices = @transform_13, window_bounds = array<i64: 1, 128>}, {pipeline_mode = #tpu.pipeline_mode<synchronous>, transform_indices = @transform_14, window_bounds = array<i64: 128, 8>}, {pipeline_mode = #tpu.pipeline_mode<synchronous>, transform_indices = @transform_15, window_bounds = array<i64: 8, 128>}, {transform_indices = @transform_16, window_bounds = array<i64: 1, 32, 128>}]} {
    %c0 = arith.constant 0 : index
    %c0_0 = arith.constant 0 : index
    %0 = vector.load %arg15[%c0, %c0_0] : memref<128x8xf32, #tpu.memory_space<vmem>>, vector<128x8xf32>
    %c0_1 = arith.constant 0 : index
    %c0_2 = arith.constant 0 : index
    %1 = vector.load %arg16[%c0_1, %c0_2] : memref<8x128xf32, #tpu.memory_space<vmem>>, vector<8x128xf32>
    %c0_3 = arith.constant 0 : index
    %c0_4 = arith.constant 0 : index
    %c0_5 = arith.constant 0 : index
    %2 = vector.load %arg1[%c0_3, %c0_4, %c0_5] : memref<1x34x64xf32, #tpu.memory_space<vmem>>, vector<1x34x64xf32>
    %3 = vector.shape_cast %2 : vector<1x34x64xf32> to vector<34x64xf32>
    %4 = vector.extract_strided_slice %3 {offsets = [0, 0], sizes = [32, 64], strides = [1, 1]} : vector<34x64xf32> to vector<32x64xf32>
    %c0_6 = arith.constant 0 : index
    %c0_7 = arith.constant 0 : index
    %c0_8 = arith.constant 0 : index
    %5 = vector.load %arg3[%c0_6, %c0_7, %c0_8] : memref<3x64x128xf32, #tpu.memory_space<vmem>>, vector<1x64x128xf32>
    %6 = vector.shape_cast %5 : vector<1x64x128xf32> to vector<64x128xf32>
    %cst = arith.constant dense<0.000000e+00> : vector<32x128xf32>
    %7 = tpu.matmul %4, %6, %cst {dimension_numbers = #tpu.dot_dimension_numbers<[1], [0], [0], [1], [0, 0, 1, 1], [], []>} : vector<32x64xf32>, vector<64x128xf32>, vector<32x128xf32> -> vector<32x128xf32>
    %8 = vector.extract_strided_slice %3 {offsets = [1, 0], sizes = [32, 64], strides = [1, 1]} : vector<34x64xf32> to vector<32x64xf32>
    %c1 = arith.constant 1 : index
    %c0_9 = arith.constant 0 : index
    %c0_10 = arith.constant 0 : index
    %9 = vector.load %arg3[%c1, %c0_9, %c0_10] : memref<3x64x128xf32, #tpu.memory_space<vmem>>, vector<1x64x128xf32>
    %10 = vector.shape_cast %9 : vector<1x64x128xf32> to vector<64x128xf32>
    %cst_11 = arith.constant dense<0.000000e+00> : vector<32x128xf32>
    %11 = tpu.matmul %8, %10, %cst_11 {dimension_numbers = #tpu.dot_dimension_numbers<[1], [0], [0], [1], [0, 0, 1, 1], [], []>} : vector<32x64xf32>, vector<64x128xf32>, vector<32x128xf32> -> vector<32x128xf32>
    %12 = arith.addf %7, %11 : vector<32x128xf32>
    %13 = vector.extract_strided_slice %3 {offsets = [2, 0], sizes = [32, 64], strides = [1, 1]} : vector<34x64xf32> to vector<32x64xf32>
    %c2 = arith.constant 2 : index
    %c0_12 = arith.constant 0 : index
    %c0_13 = arith.constant 0 : index
    %14 = vector.load %arg3[%c2, %c0_12, %c0_13] : memref<3x64x128xf32, #tpu.memory_space<vmem>>, vector<1x64x128xf32>
    %15 = vector.shape_cast %14 : vector<1x64x128xf32> to vector<64x128xf32>
    %cst_14 = arith.constant dense<0.000000e+00> : vector<32x128xf32>
    %16 = tpu.matmul %13, %15, %cst_14 {dimension_numbers = #tpu.dot_dimension_numbers<[1], [0], [0], [1], [0, 0, 1, 1], [], []>} : vector<32x64xf32>, vector<64x128xf32>, vector<32x128xf32> -> vector<32x128xf32>
    %17 = arith.addf %12, %16 : vector<32x128xf32>
    %c0_15 = arith.constant 0 : index
    %c0_16 = arith.constant 0 : index
    %18 = vector.load %arg4[%c0_15, %c0_16] : memref<1x128xf32, #tpu.memory_space<vmem>>, vector<1x128xf32>
    %19 = vector.broadcast %18 : vector<1x128xf32> to vector<32x128xf32>
    %20 = arith.addf %17, %19 : vector<32x128xf32>
    %c0_17 = arith.constant 0 : index
    %c0_18 = arith.constant 0 : index
    %21 = vector.load %arg5[%c0_17, %c0_18] : memref<1x128xf32, #tpu.memory_space<vmem>>, vector<1x128xf32>
    %c0_19 = arith.constant 0 : index
    %c0_20 = arith.constant 0 : index
    %22 = vector.load %arg6[%c0_19, %c0_20] : memref<1x128xf32, #tpu.memory_space<vmem>>, vector<1x128xf32>
    %cst_21 = arith.constant dense<0.000000e+00> : vector<128xf32>
    %23 = vector.multi_reduction <add>, %20, %cst_21 [0] : vector<32x128xf32> to vector<128xf32>
    %24 = vector.shape_cast %23 : vector<128xf32> to vector<1x128xf32>
    %25 = arith.mulf %20, %20 : vector<32x128xf32>
    %cst_22 = arith.constant dense<0.000000e+00> : vector<128xf32>
    %26 = vector.multi_reduction <add>, %25, %cst_22 [0] : vector<32x128xf32> to vector<128xf32>
    %27 = vector.shape_cast %26 : vector<128xf32> to vector<1x128xf32>
    %cst_23 = arith.constant dense<0.000000e+00> : vector<1x8xf32>
    %28 = tpu.matmul %24, %0, %cst_23 {dimension_numbers = #tpu.dot_dimension_numbers<[1], [0], [0], [1], [0, 0, 1, 1], [], []>} : vector<1x128xf32>, vector<128x8xf32>, vector<1x8xf32> -> vector<1x8xf32>
    %cst_24 = arith.constant 5.120000e+02 : f32
    %29 = vector.broadcast %cst_24 : f32 to vector<1x8xf32>
    %30 = arith.divf %28, %29 : vector<1x8xf32>
    %cst_25 = arith.constant dense<0.000000e+00> : vector<1x8xf32>
    %31 = tpu.matmul %27, %0, %cst_25 {dimension_numbers = #tpu.dot_dimension_numbers<[1], [0], [0], [1], [0, 0, 1, 1], [], []>} : vector<1x128xf32>, vector<128x8xf32>, vector<1x8xf32> -> vector<1x8xf32>
    %cst_26 = arith.constant 5.120000e+02 : f32
    %32 = vector.broadcast %cst_26 : f32 to vector<1x8xf32>
    %33 = arith.divf %31, %32 : vector<1x8xf32>
    %34 = arith.mulf %30, %30 : vector<1x8xf32>
    %35 = arith.subf %33, %34 : vector<1x8xf32>
    %cst_27 = arith.constant 9.99999974E-6 : f32
    %36 = vector.broadcast %cst_27 : f32 to vector<1x8xf32>
    %37 = arith.addf %35, %36 : vector<1x8xf32>
    %38 = math.rsqrt %37 : vector<1x8xf32>
    %cst_28 = arith.constant dense<0.000000e+00> : vector<1x128xf32>
    %39 = tpu.matmul %30, %1, %cst_28 {dimension_numbers = #tpu.dot_dimension_numbers<[1], [0], [0], [1], [0, 0, 1, 1], [], []>} : vector<1x8xf32>, vector<8x128xf32>, vector<1x128xf32> -> vector<1x128xf32>
    %cst_29 = arith.constant dense<0.000000e+00> : vector<1x128xf32>
    %40 = tpu.matmul %38, %1, %cst_29 {dimension_numbers = #tpu.dot_dimension_numbers<[1], [0], [0], [1], [0, 0, 1, 1], [], []>} : vector<1x8xf32>, vector<8x128xf32>, vector<1x128xf32> -> vector<1x128xf32>
    %41 = vector.broadcast %39 : vector<1x128xf32> to vector<32x128xf32>
    %42 = arith.subf %20, %41 : vector<32x128xf32>
    %43 = vector.broadcast %40 : vector<1x128xf32> to vector<32x128xf32>
    %44 = arith.mulf %42, %43 : vector<32x128xf32>
    %45 = vector.broadcast %21 : vector<1x128xf32> to vector<32x128xf32>
    %46 = arith.mulf %44, %45 : vector<32x128xf32>
    %47 = vector.broadcast %22 : vector<1x128xf32> to vector<32x128xf32>
    %48 = arith.addf %46, %47 : vector<32x128xf32>
    %cst_30 = arith.constant 0.000000e+00 : f32
    %49 = vector.broadcast %cst_30 : f32 to vector<32x128xf32>
    %50 = arith.maximumf %48, %49 : vector<32x128xf32>
    %51 = math.absf %48 : vector<32x128xf32>
    %cst_31 = arith.constant 0.000000e+00 : f32
    %52 = vector.broadcast %cst_31 : f32 to vector<32x128xf32>
    %53 = arith.subf %52, %51 : vector<32x128xf32>
    %54 = math.exp %53 : vector<32x128xf32>
    %cst_32 = arith.constant 1.000000e+00 : f32
    %55 = vector.broadcast %cst_32 : f32 to vector<32x128xf32>
    %56 = arith.addf %55, %54 : vector<32x128xf32>
    %57 = math.log %56 : vector<32x128xf32>
    %58 = arith.addf %50, %57 : vector<32x128xf32>
    %59 = math.tanh %58 : vector<32x128xf32>
    %60 = arith.mulf %48, %59 : vector<32x128xf32>
    %c0_33 = arith.constant 0 : index
    %c0_34 = arith.constant 0 : index
    %c0_35 = arith.constant 0 : index
    %61 = vector.load %arg2[%c0_33, %c0_34, %c0_35] : memref<1x1x32xf32, #tpu.memory_space<vmem>>, vector<1x1x32xf32>
    %62 = vector.shape_cast %61 : vector<1x1x32xf32> to vector<1x32xf32>
    %c0_36 = arith.constant 0 : index
    %c0_37 = arith.constant 0 : index
    %63 = vector.load %arg7[%c0_36, %c0_37] : memref<32x256xf32, #tpu.memory_space<vmem>>, vector<32x256xf32>
    %cst_38 = arith.constant dense<0.000000e+00> : vector<1x256xf32>
    %64 = tpu.matmul %62, %63, %cst_38 {dimension_numbers = #tpu.dot_dimension_numbers<[1], [0], [0], [1], [0, 0, 1, 1], [], []>} : vector<1x32xf32>, vector<32x256xf32>, vector<1x256xf32> -> vector<1x256xf32>
    %c0_39 = arith.constant 0 : index
    %c0_40 = arith.constant 0 : index
    %65 = vector.load %arg8[%c0_39, %c0_40] : memref<1x256xf32, #tpu.memory_space<vmem>>, vector<1x256xf32>
    %66 = arith.addf %64, %65 : vector<1x256xf32>
    %67 = vector.extract_strided_slice %66 {offsets = [0, 0], sizes = [1, 128], strides = [1, 1]} : vector<1x256xf32> to vector<1x128xf32>
    %68 = vector.extract_strided_slice %66 {offsets = [0, 128], sizes = [1, 128], strides = [1, 1]} : vector<1x256xf32> to vector<1x128xf32>
    %69 = vector.broadcast %67 : vector<1x128xf32> to vector<32x128xf32>
    %70 = arith.mulf %60, %69 : vector<32x128xf32>
    %71 = vector.broadcast %68 : vector<1x128xf32> to vector<32x128xf32>
    %72 = arith.addf %70, %71 : vector<32x128xf32>
    %cst_41 = arith.constant 0.000000e+00 : f32
    %73 = vector.broadcast %cst_41 : f32 to vector<1x128xf32>
    %c0_42 = arith.constant 0 : index
    %c0_43 = arith.constant 0 : index
    %74 = vector.load %arg18[%c0_42, %c0_43] : memref<34x128xf32, #tpu.memory_space<vmem>>, vector<1x128xf32>
    tpu.vector_store %arg18[%c0_42, %c0_43], %73 {strides = array<i32>} : memref<34x128xf32, #tpu.memory_space<vmem>>, vector<1x128xf32>,
    %c33 = arith.constant 33 : index
    %c0_44 = arith.constant 0 : index
    %75 = vector.load %arg18[%c33, %c0_44] : memref<34x128xf32, #tpu.memory_space<vmem>>, vector<1x128xf32>
    tpu.vector_store %arg18[%c33, %c0_44], %73 {strides = array<i32>} : memref<34x128xf32, #tpu.memory_space<vmem>>, vector<1x128xf32>,
    %c1_45 = arith.constant 1 : index
    %c0_46 = arith.constant 0 : index
    %76 = vector.load %arg18[%c1_45, %c0_46] : memref<34x128xf32, #tpu.memory_space<vmem>>, vector<32x128xf32>
    tpu.vector_store %arg18[%c1_45, %c0_46], %72 {strides = array<i32>} : memref<34x128xf32, #tpu.memory_space<vmem>>, vector<32x128xf32>,
    %c0_47 = arith.constant 0 : index
    %c0_48 = arith.constant 0 : index
    %77 = vector.load %arg18[%c0_47, %c0_48] : memref<34x128xf32, #tpu.memory_space<vmem>>, vector<32x128xf32>
    %c0_49 = arith.constant 0 : index
    %c0_50 = arith.constant 0 : index
    %c0_51 = arith.constant 0 : index
    %78 = vector.load %arg9[%c0_49, %c0_50, %c0_51] : memref<3x128x128xf32, #tpu.memory_space<vmem>>, vector<1x128x128xf32>
    %79 = vector.shape_cast %78 : vector<1x128x128xf32> to vector<128x128xf32>
    %cst_52 = arith.constant dense<0.000000e+00> : vector<32x128xf32>
    %80 = tpu.matmul %77, %79, %cst_52 {dimension_numbers = #tpu.dot_dimension_numbers<[1], [0], [0], [1], [0, 0, 1, 1], [], []>} : vector<32x128xf32>, vector<128x128xf32>, vector<32x128xf32> -> vector<32x128xf32>
    %c1_53 = arith.constant 1 : index
    %c0_54 = arith.constant 0 : index
    %81 = vector.load %arg18[%c1_53, %c0_54] : memref<34x128xf32, #tpu.memory_space<vmem>>, vector<32x128xf32>
    %c1_55 = arith.constant 1 : index
    %c0_56 = arith.constant 0 : index
    %c0_57 = arith.constant 0 : index
    %82 = vector.load %arg9[%c1_55, %c0_56, %c0_57] : memref<3x128x128xf32, #tpu.memory_space<vmem>>, vector<1x128x128xf32>
    %83 = vector.shape_cast %82 : vector<1x128x128xf32> to vector<128x128xf32>
    %cst_58 = arith.constant dense<0.000000e+00> : vector<32x128xf32>
    %84 = tpu.matmul %81, %83, %cst_58 {dimension_numbers = #tpu.dot_dimension_numbers<[1], [0], [0], [1], [0, 0, 1, 1], [], []>} : vector<32x128xf32>, vector<128x128xf32>, vector<32x128xf32> -> vector<32x128xf32>
    %85 = arith.addf %80, %84 : vector<32x128xf32>
    %c2_59 = arith.constant 2 : index
    %c0_60 = arith.constant 0 : index
    %86 = vector.load %arg18[%c2_59, %c0_60] : memref<34x128xf32, #tpu.memory_space<vmem>>, vector<32x128xf32>
    %c2_61 = arith.constant 2 : index
    %c0_62 = arith.constant 0 : index
    %c0_63 = arith.constant 0 : index
    %87 = vector.load %arg9[%c2_61, %c0_62, %c0_63] : memref<3x128x128xf32, #tpu.memory_space<vmem>>, vector<1x128x128xf32>
    %88 = vector.shape_cast %87 : vector<1x128x128xf32> to vector<128x128xf32>
    %cst_64 = arith.constant dense<0.000000e+00> : vector<32x128xf32>
    %89 = tpu.matmul %86, %88, %cst_64 {dimension_numbers = #tpu.dot_dimension_numbers<[1], [0], [0], [1], [0, 0, 1, 1], [], []>} : vector<32x128xf32>, vector<128x128xf32>, vector<32x128xf32> -> vector<32x128xf32>
    %90 = arith.addf %85, %89 : vector<32x128xf32>
    %c0_65 = arith.constant 0 : index
    %c0_66 = arith.constant 0 : index
    %91 = vector.load %arg10[%c0_65, %c0_66] : memref<1x128xf32, #tpu.memory_space<vmem>>, vector<1x128xf32>
    %92 = vector.broadcast %91 : vector<1x128xf32> to vector<32x128xf32>
    %93 = arith.addf %90, %92 : vector<32x128xf32>
    %c0_67 = arith.constant 0 : index
    %c0_68 = arith.constant 0 : index
    %94 = vector.load %arg11[%c0_67, %c0_68] : memref<1x128xf32, #tpu.memory_space<vmem>>, vector<1x128xf32>
    %c0_69 = arith.constant 0 : index
    %c0_70 = arith.constant 0 : index
    %95 = vector.load %arg12[%c0_69, %c0_70] : memref<1x128xf32, #tpu.memory_space<vmem>>, vector<1x128xf32>
    %cst_71 = arith.constant dense<0.000000e+00> : vector<128xf32>
    %96 = vector.multi_reduction <add>, %93, %cst_71 [0] : vector<32x128xf32> to vector<128xf32>
    %97 = vector.shape_cast %96 : vector<128xf32> to vector<1x128xf32>
    %98 = arith.mulf %93, %93 : vector<32x128xf32>
    %cst_72 = arith.constant dense<0.000000e+00> : vector<128xf32>
    %99 = vector.multi_reduction <add>, %98, %cst_72 [0] : vector<32x128xf32> to vector<128xf32>
    %100 = vector.shape_cast %99 : vector<128xf32> to vector<1x128xf32>
    %cst_73 = arith.constant dense<0.000000e+00> : vector<1x8xf32>
    %101 = tpu.matmul %97, %0, %cst_73 {dimension_numbers = #tpu.dot_dimension_numbers<[1], [0], [0], [1], [0, 0, 1, 1], [], []>} : vector<1x128xf32>, vector<128x8xf32>, vector<1x8xf32> -> vector<1x8xf32>
    %cst_74 = arith.constant 5.120000e+02 : f32
    %102 = vector.broadcast %cst_74 : f32 to vector<1x8xf32>
    %103 = arith.divf %101, %102 : vector<1x8xf32>
    %cst_75 = arith.constant dense<0.000000e+00> : vector<1x8xf32>
    %104 = tpu.matmul %100, %0, %cst_75 {dimension_numbers = #tpu.dot_dimension_numbers<[1], [0], [0], [1], [0, 0, 1, 1], [], []>} : vector<1x128xf32>, vector<128x8xf32>, vector<1x8xf32> -> vector<1x8xf32>
    %cst_76 = arith.constant 5.120000e+02 : f32
    %105 = vector.broadcast %cst_76 : f32 to vector<1x8xf32>
    %106 = arith.divf %104, %105 : vector<1x8xf32>
    %107 = arith.mulf %103, %103 : vector<1x8xf32>
    %108 = arith.subf %106, %107 : vector<1x8xf32>
    %cst_77 = arith.constant 9.99999974E-6 : f32
    %109 = vector.broadcast %cst_77 : f32 to vector<1x8xf32>
    %110 = arith.addf %108, %109 : vector<1x8xf32>
    %111 = math.rsqrt %110 : vector<1x8xf32>
    %cst_78 = arith.constant dense<0.000000e+00> : vector<1x128xf32>
    %112 = tpu.matmul %103, %1, %cst_78 {dimension_numbers = #tpu.dot_dimension_numbers<[1], [0], [0], [1], [0, 0, 1, 1], [], []>} : vector<1x8xf32>, vector<8x128xf32>, vector<1x128xf32> -> vector<1x128xf32>
    %cst_79 = arith.constant dense<0.000000e+00> : vector<1x128xf32>
    %113 = tpu.matmul %111, %1, %cst_79 {dimension_numbers = #tpu.dot_dimension_numbers<[1], [0], [0], [1], [0, 0, 1, 1], [], []>} : vector<1x8xf32>, vector<8x128xf32>, vector<1x128xf32> -> vector<1x128xf32>
    %114 = vector.broadcast %112 : vector<1x128xf32> to vector<32x128xf32>
    %115 = arith.subf %93, %114 : vector<32x128xf32>
    %116 = vector.broadcast %113 : vector<1x128xf32> to vector<32x128xf32>
    %117 = arith.mulf %115, %116 : vector<32x128xf32>
    %118 = vector.broadcast %94 : vector<1x128xf32> to vector<32x128xf32>
    %119 = arith.mulf %117, %118 : vector<32x128xf32>
    %120 = vector.broadcast %95 : vector<1x128xf32> to vector<32x128xf32>
    %121 = arith.addf %119, %120 : vector<32x128xf32>
    %cst_80 = arith.constant 0.000000e+00 : f32
    %122 = vector.broadcast %cst_80 : f32 to vector<32x128xf32>
    %123 = arith.maximumf %121, %122 : vector<32x128xf32>
    %124 = math.absf %121 : vector<32x128xf32>
    %cst_81 = arith.constant 0.000000e+00 : f32
    %125 = vector.broadcast %cst_81 : f32 to vector<32x128xf32>
    %126 = arith.subf %125, %124 : vector<32x128xf32>
    %127 = math.exp %126 : vector<32x128xf32>
    %cst_82 = arith.constant 1.000000e+00 : f32
    %128 = vector.broadcast %cst_82 : f32 to vector<32x128xf32>
    %129 = arith.addf %128, %127 : vector<32x128xf32>
    %130 = math.log %129 : vector<32x128xf32>
    %131 = arith.addf %123, %130 : vector<32x128xf32>
    %132 = math.tanh %131 : vector<32x128xf32>
    %133 = arith.mulf %121, %132 : vector<32x128xf32>
    %134 = vector.extract_strided_slice %3 {offsets = [1, 0], sizes = [32, 64], strides = [1, 1]} : vector<34x64xf32> to vector<32x64xf32>
    %c0_83 = arith.constant 0 : index
    %c0_84 = arith.constant 0 : index
    %135 = vector.load %arg13[%c0_83, %c0_84] : memref<64x128xf32, #tpu.memory_space<vmem>>, vector<64x128xf32>
    %cst_85 = arith.constant dense<0.000000e+00> : vector<32x128xf32>
    %136 = tpu.matmul %134, %135, %cst_85 {dimension_numbers = #tpu.dot_dimension_numbers<[1], [0], [0], [1], [0, 0, 1, 1], [], []>} : vector<32x64xf32>, vector<64x128xf32>, vector<32x128xf32> -> vector<32x128xf32>
    %c0_86 = arith.constant 0 : index
    %c0_87 = arith.constant 0 : index
    %137 = vector.load %arg14[%c0_86, %c0_87] : memref<1x128xf32, #tpu.memory_space<vmem>>, vector<1x128xf32>
    %138 = vector.broadcast %137 : vector<1x128xf32> to vector<32x128xf32>
    %139 = arith.addf %136, %138 : vector<32x128xf32>
    %140 = arith.addf %133, %139 : vector<32x128xf32>
    %c0_88 = arith.constant 0 : index
    %c0_89 = arith.constant 0 : index
    %c0_90 = arith.constant 0 : index
    %141 = vector.load %arg17[%c0_88, %c0_89, %c0_90] : memref<1x32x128xf32, #tpu.memory_space<vmem>>, vector<1x32x128xf32>
    %142 = vector.shape_cast %141 : vector<1x32x128xf32> to vector<32x128xf32>
    %143 = vector.shape_cast %140 : vector<32x128xf32> to vector<1x32x128xf32>
    tpu.vector_store %arg17[%c0_88, %c0_89, %c0_90], %143 {strides = array<i32>} : memref<1x32x128xf32, #tpu.memory_space<vmem>>, vector<1x32x128xf32>,
    return
  }
  func.func @transform_0(%arg0: i32) -> (i32, i32, i32) {
    %c0_i32 = arith.constant 0 : i32
    %c0_i32_0 = arith.constant 0 : i32
    %c0_i32_1 = arith.constant 0 : i32
    return %arg0, %c0_i32, %c0_i32_0 : i32, i32, i32
  }
  func.func @transform_1(%arg0: i32) -> (i32, i32, i32) {
    %c0_i32 = arith.constant 0 : i32
    %c0_i32_0 = arith.constant 0 : i32
    %c0_i32_1 = arith.constant 0 : i32
    return %arg0, %c0_i32, %c0_i32_0 : i32, i32, i32
  }
  func.func @transform_2(%arg0: i32) -> (i32, i32, i32) {
    %c0_i32 = arith.constant 0 : i32
    %c0_i32_0 = arith.constant 0 : i32
    %c0_i32_1 = arith.constant 0 : i32
    %c0_i32_2 = arith.constant 0 : i32
    return %c0_i32, %c0_i32_0, %c0_i32_1 : i32, i32, i32
  }
  func.func @transform_3(%arg0: i32) -> (i32, i32) {
    %c0_i32 = arith.constant 0 : i32
    %c0_i32_0 = arith.constant 0 : i32
    %c0_i32_1 = arith.constant 0 : i32
    return %c0_i32, %c0_i32_0 : i32, i32
  }
  func.func @transform_4(%arg0: i32) -> (i32, i32) {
    %c0_i32 = arith.constant 0 : i32
    %c0_i32_0 = arith.constant 0 : i32
    %c0_i32_1 = arith.constant 0 : i32
    return %c0_i32, %c0_i32_0 : i32, i32
  }
  func.func @transform_5(%arg0: i32) -> (i32, i32) {
    %c0_i32 = arith.constant 0 : i32
    %c0_i32_0 = arith.constant 0 : i32
    %c0_i32_1 = arith.constant 0 : i32
    return %c0_i32, %c0_i32_0 : i32, i32
  }
  func.func @transform_6(%arg0: i32) -> (i32, i32) {
    %c0_i32 = arith.constant 0 : i32
    %c0_i32_0 = arith.constant 0 : i32
    %c0_i32_1 = arith.constant 0 : i32
    return %c0_i32, %c0_i32_0 : i32, i32
  }
  func.func @transform_7(%arg0: i32) -> (i32, i32) {
    %c0_i32 = arith.constant 0 : i32
    %c0_i32_0 = arith.constant 0 : i32
    %c0_i32_1 = arith.constant 0 : i32
    return %c0_i32, %c0_i32_0 : i32, i32
  }
  func.func @transform_8(%arg0: i32) -> (i32, i32, i32) {
    %c0_i32 = arith.constant 0 : i32
    %c0_i32_0 = arith.constant 0 : i32
    %c0_i32_1 = arith.constant 0 : i32
    %c0_i32_2 = arith.constant 0 : i32
    return %c0_i32, %c0_i32_0, %c0_i32_1 : i32, i32, i32
  }
  func.func @transform_9(%arg0: i32) -> (i32, i32) {
    %c0_i32 = arith.constant 0 : i32
    %c0_i32_0 = arith.constant 0 : i32
    %c0_i32_1 = arith.constant 0 : i32
    return %c0_i32, %c0_i32_0 : i32, i32
  }
  func.func @transform_10(%arg0: i32) -> (i32, i32) {
    %c0_i32 = arith.constant 0 : i32
    %c0_i32_0 = arith.constant 0 : i32
    %c0_i32_1 = arith.constant 0 : i32
    return %c0_i32, %c0_i32_0 : i32, i32
  }
  func.func @transform_11(%arg0: i32) -> (i32, i32) {
    %c0_i32 = arith.constant 0 : i32
    %c0_i32_0 = arith.constant 0 : i32
    %c0_i32_1 = arith.constant 0 : i32
    return %c0_i32, %c0_i32_0 : i32, i32
  }
  func.func @transform_12(%arg0: i32) -> (i32, i32) {
    %c0_i32 = arith.constant 0 : i32
    %c0_i32_0 = arith.constant 0 : i32
    %c0_i32_1 = arith.constant 0 : i32
    return %c0_i32, %c0_i32_0 : i32, i32
  }
  func.func @transform_13(%arg0: i32) -> (i32, i32) {
    %c0_i32 = arith.constant 0 : i32
    %c0_i32_0 = arith.constant 0 : i32
    %c0_i32_1 = arith.constant 0 : i32
    return %c0_i32, %c0_i32_0 : i32, i32
  }
  func.func @transform_14(%arg0: i32) -> (i32, i32) {
    %c0_i32 = arith.constant 0 : i32
    %c0_i32_0 = arith.constant 0 : i32
    %c0_i32_1 = arith.constant 0 : i32
    return %c0_i32, %c0_i32_0 : i32, i32
  }
  func.func @transform_15(%arg0: i32) -> (i32, i32) {
    %c0_i32 = arith.constant 0 : i32
    %c0_i32_0 = arith.constant 0 : i32
    %c0_i32_1 = arith.constant 0 : i32
    return %c0_i32, %c0_i32_0 : i32, i32
  }
  func.func @transform_16(%arg0: i32) -> (i32, i32, i32) {
    %c0_i32 = arith.constant 0 : i32
    %c0_i32_0 = arith.constant 0 : i32
    %c0_i32_1 = arith.constant 0 : i32
    return %arg0, %c0_i32, %c0_i32_0 : i32, i32, i32
  }
}

</mosaic_0001>

<bundles_post_ra>
// kernel: tpu_custom_call.1
= control target key start
LH: loop header
LB: loop body
LE: loop exit
PB: predicated region body
PF: predicated region fallthrough
CT: control target
= control target key end

     0   :  { %s4915_s0 = inlined_call_operand.vmem [shape: f32[2,34,64], index: 0, kind: input, shape index: {}]   ;;  %s4916_s1 = inlined_call_operand.hbm [shape: f32[2,1,32], index: 1, kind: input, shape index: {}]   ;;  %s4917_s2 = inlined_call_operand.vmem [shape: f32[3,64,128], index: 2, kind: input, shape index: {}]   ;;  %s4918_s3 = inlined_call_operand.vmem [shape: f32[1,128], index: 3, kind: input, shape index: {}]   ;;  %s4919_s4 = inlined_call_operand.hbm [shape: f32[1,128], index: 4, kind: input, shape index: {}]   ;;  %s4920_s5 = inlined_call_operand.hbm [shape: f32[1,128], index: 5, kind: input, shape index: {}]   ;;  %s4921_s6 = inlined_call_operand.vmem [shape: f32[32,256], index: 6, kind: input, shape index: {}]   ;;  %s4922_s7 = inlined_call_operand.hbm [shape: f32[1,256], index: 7, kind: input, shape index: {}]   ;;  %s4923_s8 = inlined_call_operand.hbm [shape: f32[3,128,128], index: 8, kind: input, shape index: {}]   ;;  %s4924_s9 = inlined_call_operand.hbm [shape: f32[1,128], index: 9, kind: input, shape index: {}]   ;;  %s4925_s10 = inlined_call_operand.hbm [shape: f32[1,128], index: 10, kind: input, shape index: {}]   ;;  %s4926_s11 = inlined_call_operand.hbm [shape: f32[1,128], index: 11, kind: input, shape index: {}]   ;;  %s4927_s12 = inlined_call_operand.vmem [shape: f32[64,128], index: 12, kind: input, shape index: {}]   ;;  %s4928_s13 = inlined_call_operand.hbm [shape: f32[1,128], index: 13, kind: input, shape index: {}]   ;;  %s4929_s14 = inlined_call_operand.vmem [shape: f32[128,8], index: 14, kind: input, shape index: {}]   ;;  %s4930_s15 = inlined_call_operand.vmem [shape: f32[8,128], index: 15, kind: input, shape index: {}]   ;;  %s4931_s16 = inlined_call_operand.hbm [shape: f32[2,32,128], index: 16, kind: output, shape index: {}]  }
   0x1   :  { %4940 = sst [smem:[#allocation25_spill]] %s4915_s0 }
   0x2   :  { %4941 = sst [smem:[#allocation26_spill]] %s4916_s1 }
   0x3   :  { %4942 = sst [smem:[#allocation27_spill]] %s4918_s3 }
   0x4   :  { %4943 = sst [smem:[#allocation28_spill]] %s4919_s4 }
   0x5   :  { %4944 = sst [smem:[#allocation29_spill]] %s4921_s6 }
   0x6   :  { %4945 = sst [smem:[#allocation30_spill]] %s4927_s12 }
   0x7   :  { %4946 = sst [smem:[#allocation31_spill]] %s4929_s14 }
   0x8   :  { %4947 = sst [smem:[#allocation32_spill]] %s4930_s15 }
   0x9   :  { %4948 = sst [smem:[#allocation33_spill]] %s4931_s16 }
   0xa   :  { %21 = vsyncpa [#allocation4], 0 }
   0xb   :  { %23 = vsyncpa [#allocation4 + $0x1], 0 }
   0xc   :  { %24 = vsyncpa [#allocation7], 0 }
   0xd   :  { %25 = vsyncpa [#allocation10], 0 }
   0xe   :  { %26 = vsyncpa [#allocation13], 0 }
   0xf   :  { %27 = vsyncpa [#allocation16], 0 }
  0x10   :  { %28 = vsyncpa [#allocation5], 0 }
  0x11   :  { %30 = vsyncpa [#allocation5 + $0x1], 0  ;;  %s4074_s21 = smov 0   ;;  %s4076_s22 = smov 0  }
  0x12   :  { %s4078_s23 = smov 0   ;;  %s4080_s24 = smov 0  }
  0x13 LB: > { %s3972_s25 = smov [#allocation6]   ;;  %s4095_s27 = sadd.s32 4294967295, %s3970_s24   ;;  %s3970_s24 = sphi %s4080_s24, %s4983_s24   ;;  %s3966_s23 = sphi %s4078_s23, %s4982_s23   ;;  %s3962_s22 = sphi %s4076_s22, %s4981_s22   ;;  %s3958_s21 = sphi %s4074_s21, %s4980_s21  }
  0x14   : > { %s432_s26 = sshll.u32 %s3972_s25, 4  ;;  %p2549_p0 = scmp.ge.s32.totalorder %s3970_s24, 1  ;;  %s4100_s26 = int_to_ptr.vmem [resolvable:$true] %s432_s26 }
  0x15   : > { %p4936_p1 = scmp.eq.s32.totalorder %s4095_s27, 0  ;;  %p413_p2 = scmp.lt.s32.totalorder %s3970_s24, 3 }
  0x16   : > { %s3973_s29 = smov [#allocation9]   ;;  %s3974_s0 = smov [#allocation12]  }
  0x17   : > { %p4102_p3 = pnand %p2549_p0, %p413_p2  ;;  %s457_s30 = sshll.u32 %s3973_s29, 4  ;;  %s4109_s30 = int_to_ptr.vmem [resolvable:$true] %s457_s30 }
  0x18   : > { %s481_s17 = sshll.u32 %s3974_s0, 4  ;;  %s3975_s19 = smov [#allocation15]   ;;  %s4117_s17 = int_to_ptr.vmem [resolvable:$true] %s481_s17 }
  0x19   : > { %s4949_s28 = scalar_select %p4102_p3, 1, 0 }
  0x1a   : > { %p3484_p5 = pneg %p4102_p3  ;;  %s4119_s20 = sshll.u32 %s3975_s19, 4  ;;  %s504_s20 = int_to_ptr.vmem [resolvable:$true] %s4119_s20 }
  0x1b   : > { %s4951_s4 = sld [smem:[#allocation28_spill]] }
  0x1c   : > { %p4113_p6 = pnand %p3484_p5, %p4936_p1 }
  0x1e   : > { %p4129_p8 = pneg %p4113_p6 }
  0x21   : > { %s3634_s12 = scalar_lea.hbm %s4951_s4, 16 }
  0x22   : > { %p3635_p7 = scmp.ne.s32.totalorder %s4951_s4, %s3634_s12  ;;  %p3641_p11 = scmp.lt.u32.totalorder %s3634_s12, %s4951_s4 }
  0x24   : > { %p3637_p9 = pnand %p4129_p8, %p3635_p7 }
  0x26   : > { %p3638_p10 = pneg %p3637_p9 }
  0x28   : > { %p3643_p12 = pnand %p3641_p11, %p3638_p10 }
  0x2a   : > { %3646 = shalt.err (!%p3643_p12)
}
  0x2b   : > { %s3647_s6 = scalar_lea.vmem %s4100_s26, 16  ;;  %s3654_s16 = scalar_lea.vmem %s4100_s26, 32 }
  0x2c   : > { %p3648_p13 = scmp.ne.s32.totalorder %s4100_s26, %s3647_s6  ;;  %p3655_p5 = scmp.lt.s32.totalorder %s4100_s26, %s4100_s26 }
  0x2d   : > { %p3656_p7 = scmp.lt.s32.totalorder %s3654_s16, %s3647_s6 }
  0x2e   : > { %p3650_p0 = pnand %p3648_p13, %p4129_p8 }
  0x2f   : > { %p3657_p9 = por %p3656_p7, %p3655_p5 }
  0x30   : > { %p3651_p2 = pneg %p3650_p0 }
  0x32   : > { %p3658_p4 = pnand %p3657_p9, %p3651_p2 }
  0x34   : > { %3661 = shalt.err (!%p3658_p4)
}
  0x35   : > { %3487 = dma.hbm_to_vmem [thread:$0]  (!%p4113_p6), %s4951_s4, 16, %s4100_s26, [#allocation7]  }
  0x36   : > { %s3662_s19 = scalar_lea.hbm %s4922_s7, 32 }
  0x37   : > { %p3663_p10 = scmp.ne.s32.totalorder %s4922_s7, %s3662_s19  ;;  %p3669_p4 = scmp.lt.u32.totalorder %s3662_s19, %s4922_s7 }
  0x39   : > { %p3665_p11 = pnand %p3663_p10, %p4129_p8 }
  0x3b   : > { %p3666_p12 = pneg %p3665_p11 }
  0x3d   : > { %p3671_p13 = pnand %p3669_p4, %p3666_p12 }
  0x3f   : > { %3674 = shalt.err (!%p3671_p13)
}
  0x40   : > { %s3675_s26 = scalar_lea.vmem %s4109_s30, 32  ;;  %p3683_p7 = scmp.lt.s32.totalorder %s4109_s30, %s4109_s30 }
  0x41   : > { %p3676_p0 = scmp.ne.s32.totalorder %s4109_s30, %s3675_s26  ;;  %p3684_p9 = scmp.lt.s32.totalorder %s3675_s26, %s3675_s26 }
  0x43   : > { %p3678_p2 = pnand %p3676_p0, %p4129_p8  ;;  %p3685_p10 = por %p3684_p9, %p3683_p7 }
  0x45   : > { %p3679_p5 = pneg %p3678_p2 }
  0x47   : > { %p3686_p11 = pnand %p3685_p10, %p3679_p5 }
  0x49   : > { %3689 = shalt.err (!%p3686_p11)
}
  0x4a   : > { %3493 = dma.hbm_to_vmem [thread:$0]  (!%p4113_p6), %s4922_s7, 32, %s4109_s30, [#allocation10]  }
  0x4b   : > { %s3690_s25 = scalar_lea.hbm %s4924_s9, 16 }
  0x4c   : > { %p3691_p12 = scmp.ne.s32.totalorder %s4924_s9, %s3690_s25  ;;  %p3697_p0 = scmp.lt.u32.totalorder %s3690_s25, %s4924_s9 }
  0x4e   : > { %p3693_p4 = pnand %p3691_p12, %p4129_p8 }
  0x50   : > { %p3694_p13 = pneg %p3693_p4 }
  0x52   : > { %p3699_p2 = pnand %p3697_p0, %p3694_p13 }
  0x54   : > { %3702 = shalt.err (!%p3699_p2)
}
  0x55   : > { %s3703_s30 = scalar_lea.vmem %s4117_s17, 16  ;;  %s3710_s26 = scalar_lea.vmem %s4117_s17, 32 }
  0x56   : > { %p3704_p5 = scmp.ne.s32.totalorder %s4117_s17, %s3703_s30  ;;  %p3711_p10 = scmp.lt.s32.totalorder %s4117_s17, %s4117_s17 }
  0x57   : > { %p3712_p11 = scmp.lt.s32.totalorder %s3710_s26, %s3703_s30 }
  0x58   : > { %p3706_p7 = pnand %p3704_p5, %p4129_p8 }
  0x59   : > { %p3713_p12 = por %p3712_p11, %p3711_p10 }
  0x5a   : > { %p3707_p9 = pneg %p3706_p7 }
  0x5c   : > { %p3714_p4 = pnand %p3713_p12, %p3707_p9 }
  0x5e   : > { %3717 = shalt.err (!%p3714_p4)
}
  0x5f   : > { %3499 = dma.hbm_to_vmem [thread:$0]  (!%p4113_p6), %s4924_s9, 16, %s4117_s17, [#allocation13]  }
  0x60   : > { %s3976_s12 = smov [#allocation8]   ;;  %s3718_s19 = scalar_lea.hbm %s4926_s11, 16 }
  0x61   : > { %s443_s15 = sshll.u32 %s3976_s12, 4  ;;  %p3719_p13 = scmp.ne.s32.totalorder %s4926_s11, %s3718_s19  ;;  %s444_s15 = int_to_ptr.vmem [resolvable:$true] %s443_s15 }
  0x62   : > { %p3725_p5 = scmp.lt.u32.totalorder %s3718_s19, %s4926_s11 }
  0x63   : > { %p3721_p0 = pnand %p3719_p13, %p4129_p8 }
  0x65   : > { %p3722_p2 = pneg %p3721_p0 }
  0x67   : > { %p3727_p7 = pnand %p3725_p5, %p3722_p2 }
  0x69   : > { %3730 = shalt.err (!%p3727_p7)
}
  0x6a   : > { %s3731_s17 = scalar_lea.vmem %s504_s20, 16  ;;  %s3738_s3 = scalar_lea.vmem %s504_s20, 32 }
  0x6b   : > { %p3732_p9 = scmp.ne.s32.totalorder %s504_s20, %s3731_s17  ;;  %p3739_p12 = scmp.lt.s32.totalorder %s504_s20, %s504_s20 }
  0x6c   : > { %p3740_p4 = scmp.lt.s32.totalorder %s3738_s3, %s3731_s17 }
  0x6d   : > { %p3734_p10 = pnand %p3732_p9, %p4129_p8 }
  0x6e   : > { %p3741_p1 = por %p3740_p4, %p3739_p12 }
  0x6f   : > { %p3735_p11 = pneg %p3734_p10 }
  0x71   : > { %p3742_p3 = pnand %p3741_p1, %p3735_p11 }
  0x73   : > { %3745 = shalt.err (!%p3742_p3)
}
  0x74   : > { %3505 = dma.hbm_to_vmem [thread:$0]  (!%p4113_p6), %s4926_s11, 16, %s504_s20, [#allocation16]  }
  0x75   : > { %s3746_s19 = scalar_lea.hbm %s4920_s5, 16 }
  0x76   : > { %p3747_p13 = scmp.ne.s32.totalorder %s4920_s5, %s3746_s19  ;;  %p3753_p3 = scmp.lt.u32.totalorder %s3746_s19, %s4920_s5 }
  0x78   : > { %p3749_p0 = pnand %p3747_p13, %p4129_p8 }
  0x7a   : > { %p3750_p1 = pneg %p3749_p0 }
  0x7c   : > { %p3755_p2 = pnand %p3753_p3, %p3750_p1 }
  0x7e   : > { %3758 = shalt.err (!%p3755_p2)
}
  0x7f   : > { %s3759_s17 = scalar_lea.vmem %s444_s15, 16  ;;  %s3766_s20 = scalar_lea.vmem %s444_s15, 32 }
  0x80   : > { %p3760_p5 = scmp.ne.s32.totalorder %s444_s15, %s3759_s17  ;;  %p3767_p10 = scmp.lt.s32.totalorder %s444_s15, %s444_s15 }
  0x81   : > { %p3768_p11 = scmp.lt.s32.totalorder %s3766_s20, %s3759_s17 }
  0x82   : > { %p3762_p7 = pnand %p3760_p5, %p4129_p8 }
  0x83   : > { %p3769_p12 = por %p3768_p11, %p3767_p10 }
  0x84   : > { %p3763_p9 = pneg %p3762_p7 }
  0x86   : > { %p3770_p4 = pnand %p3769_p12, %p3763_p9 }
  0x88   : > { %3773 = shalt.err (!%p3770_p4)
}
  0x89   : > { %3490 = dma.hbm_to_vmem [thread:$0]  (!%p4113_p6), %s4920_s5, 16, %s444_s15, [#allocation7]  }
  0x8a   : > { %s3977_s12 = smov [#allocation11]   ;;  %s3774_s6 = scalar_lea.hbm %s4923_s8, 6144 }
  0x8b   : > { %s467_s25 = sshll.u32 %s3977_s12, 4  ;;  %p3775_p13 = scmp.ne.s32.totalorder %s4923_s8, %s3774_s6  ;;  %s468_s25 = int_to_ptr.vmem [resolvable:$true] %s467_s25 }
  0x8c   : > { %p3781_p3 = scmp.lt.u32.totalorder %s3774_s6, %s4923_s8 }
  0x8d   : > { %p3777_p0 = pnand %p3775_p13, %p4129_p8 }
  0x8f   : > { %p3778_p1 = pneg %p3777_p0 }
  0x91   : > { %p3783_p2 = pnand %p3781_p3, %p3778_p1 }
  0x93   : > { %3786 = shalt.err (!%p3783_p2)
}
  0x94   : > { %s3787_s15 = scalar_lea.vmem %s468_s25, 6144  ;;  %p3795_p10 = scmp.lt.s32.totalorder %s468_s25, %s468_s25 }
  0x95   : > { %p3788_p5 = scmp.ne.s32.totalorder %s468_s25, %s3787_s15  ;;  %p3796_p11 = scmp.lt.s32.totalorder %s3787_s15, %s3787_s15 }
  0x97   : > { %p3790_p7 = pnand %p3788_p5, %p4129_p8  ;;  %p3797_p12 = por %p3796_p11, %p3795_p10 }
  0x99   : > { %p3791_p9 = pneg %p3790_p7 }
  0x9b   : > { %p3798_p4 = pnand %p3797_p12, %p3791_p9 }
  0x9d   : > { %3801 = shalt.err (!%p3798_p4)
}
  0x9e   : > { %s3978_s20 = smov 128   ;;  %s3979_s3 = smov 8  }
  0x9f   : > { %3496 = dma.hbm_to_vmem [thread:$0]  (!%p4113_p6), %s4923_s8, 6144, %s468_s25, [#allocation10], %s3978_s20, %s3978_s20, %s3979_s3  }
  0xa0   : > { %s3980_s29 = smov [#allocation14]   ;;  %s3981_s6 = smov [#allocation17]  }
  0xa1   : > { %s492_s19 = sshll.u32 %s3980_s29, 4  ;;  %s517_s16 = sshll.u32 %s3981_s6, 4  ;;  %s493_s19 = int_to_ptr.vmem [resolvable:$true] %s492_s19  ;;  %s4253_s16 = int_to_ptr.vmem [resolvable:$true] %s517_s16 }
  0xa2   : > { %s3802_s17 = scalar_lea.hbm %s4925_s10, 16 }
  0xa3   : > { %p3803_p13 = scmp.ne.s32.totalorder %s4925_s10, %s3802_s17  ;;  %p3809_p3 = scmp.lt.u32.totalorder %s3802_s17, %s4925_s10 }
  0xa5   : > { %p3805_p0 = pnand %p3803_p13, %p4129_p8 }
  0xa7   : > { %p3806_p1 = pneg %p3805_p0 }
  0xa9   : > { %p3811_p2 = pnand %p3809_p3, %p3806_p1 }
  0xab   : > { %3814 = shalt.err (!%p3811_p2)
}
  0xac   : > { %s3815_s20 = scalar_lea.vmem %s493_s19, 16  ;;  %s3822_s3 = scalar_lea.vmem %s493_s19, 32 }
  0xad   : > { %p3816_p5 = scmp.ne.s32.totalorder %s493_s19, %s3815_s20  ;;  %p3823_p10 = scmp.lt.s32.totalorder %s493_s19, %s493_s19 }
  0xae   : > { %p3824_p11 = scmp.lt.s32.totalorder %s3822_s3, %s3815_s20 }
  0xaf   : > { %p3818_p7 = pnand %p3816_p5, %p4129_p8 }
  0xb0   : > { %p3825_p12 = por %p3824_p11, %p3823_p10 }
  0xb1   : > { %p3819_p9 = pneg %p3818_p7 }
  0xb3   : > { %p3826_p4 = pnand %p3825_p12, %p3819_p9 }
  0xb5   : > { %3829 = shalt.err (!%p3826_p4)
}
  0xb6   : > { %3502 = dma.hbm_to_vmem [thread:$0]  (!%p4113_p6), %s4925_s10, 16, %s493_s19, [#allocation13]  }
  0xb7   : > { %s3830_s30 = scalar_lea.hbm %s4928_s13, 16 }
  0xb8   : > { %p3831_p13 = scmp.ne.s32.totalorder %s4928_s13, %s3830_s30  ;;  %p3837_p3 = scmp.lt.u32.totalorder %s3830_s30, %s4928_s13 }
  0xba   : > { %p3833_p0 = pnand %p3831_p13, %p4129_p8 }
  0xbc   : > { %p3834_p1 = pneg %p3833_p0 }
  0xbe   : > { %p3839_p2 = pnand %p3837_p3, %p3834_p1 }
  0xc0   : > { %3842 = shalt.err (!%p3839_p2)
}
  0xc1   : > { %s3843_s19 = scalar_lea.vmem %s4253_s16, 16  ;;  %s3850_s25 = scalar_lea.vmem %s4253_s16, 32 }
  0xc2   : > { %p3844_p5 = scmp.ne.s32.totalorder %s4253_s16, %s3843_s19  ;;  %p3851_p10 = scmp.lt.s32.totalorder %s4253_s16, %s4253_s16 }
  0xc3   : > { %p3852_p11 = scmp.lt.s32.totalorder %s3850_s25, %s3843_s19 }
  0xc4   : > { %p3846_p7 = pnand %p3844_p5, %p4129_p8 }
  0xc5   : > { %p3853_p12 = por %p3852_p11, %p3851_p10 }
  0xc6   : > { %p3847_p9 = pneg %p3846_p7 }
  0xc8   : > { %p3854_p4 = pnand %p3853_p12, %p3847_p9 }
  0xca   : > { %3857 = shalt.err (!%p3854_p4)
}
  0xcb   : > { %3508 = dma.hbm_to_vmem [thread:$0]  (!%p4113_p6), %s4928_s13, 16, %s4253_s16, [#allocation16]  }
  0xcc   : > { %s2548_s18 = sadd.s32 4294967294, %s3970_s24   ;;  %s4299_s0 = sadd.s32 1, %s3970_s24  }
  0xcd   : > { %s66_s4 = ssub.s32 %s3970_s24, %s4299_s0  ;;  %s69_s12 = sadd.s32 1, %s3966_s23 }
  0xce   : > { %p67_p8 = scmp.eq.s32.totalorder %s66_s4, 0  ;;  %p76_p13 = scmp.ne.s32.totalorder %s3966_s23, %s3962_s22 }
  0xcf   : > { %p77_p0 = scmp.eq.s32.totalorder %s3970_s24, 0  ;;  %p82_p1 = scmp.ne.s32.totalorder %s3962_s22, %s3958_s21 }
  0xd0   : > { %s4310_s29 = scalar_select %p67_p8, %s3966_s23, %s69_s12  }
  0xd1   : > { %p4312_p3 = por %p77_p0, %p76_p13  ;;  %p4954_p2 = scmp.eq.s32.totalorder %s4095_s27, 0 }
  0xd2   : > { %p400_p5 = scmp.eq.s32.totalorder %s4095_s27, 1  ;;  %p406_p7 = scmp.eq.s32.totalorder %s2548_s18, 1 }
  0xd3   : > { %p4318_p6 = por %p4954_p2, %p82_p1  ;;  %p3525_p9 = scmp.lt.s32.totalorder %s3970_s24, 2 }
  0xd4   : > { %s542_s30 = sand.u32 1, %s3966_s23   ;;  %p4325_p10 = por %p400_p5, %p76_p13 }
  0xd5   : > { %p4329_p11 = por %p406_p7, %p82_p1  ;;  %s2559_s15 = sshll.u32 %s3970_s24, 4 }
  0xd6   : > { %s4956_s26 = scalar_select %p4325_p10, 1, 0 }
  0xd7   : > { %s4957_s17 = scalar_select %p4329_p11, 1, 0 }
  0xd8   : > { %s545_s14 = scalar_lea.vmem [#allocation3], %s542_s30  ;;  %s4958_s1 = sld [smem:[#allocation26_spill]] }
  0xd9   : > { %s552_s19 = sshll.u32 %s545_s14, 4  ;;  %p4343_p12 = pnand %p3525_p9, %p4312_p3  ;;  %s4339_s19 = int_to_ptr.vmem [resolvable:$true] %s552_s19 }
  0xda   : > { %s543_s4 = scalar_lea.sflag [#allocation4], %s542_s30 }
  0xdb   : > { %p3860_p8 = pneg %p4343_p12 }
  0xde   : > { %s4337_s3 = scalar_lea.hbm %s4958_s1, %s2559_s15  ;;  %s3863_s25 = scalar_lea.hbm %s4958_s1, 32 }
  0xdf   : > { %s3858_s12 = scalar_lea.hbm %s4337_s3, 16  ;;  %p3864_p1 = scmp.lt.u32.totalorder %s4337_s3, %s4958_s1 }
  0xe0   : > { %p3859_p4 = scmp.ne.s32.totalorder %s4337_s3, %s3858_s12  ;;  %p3865_p3 = scmp.lt.u32.totalorder %s3863_s25, %s3858_s12 }
  0xe1   : > { %p3867_p5 = scmp.lt.u32.totalorder %s3858_s12, %s4337_s3 }
  0xe2   : > { %p3861_p13 = pnand %p3860_p8, %p3859_p4  ;;  %p3866_p2 = por %p3865_p3, %p3864_p1 }
  0xe4   : > { %p3862_p0 = pneg %p3861_p13  ;;  %p3868_p7 = por %p3867_p5, %p3866_p2 }
  0xe6   : > { %p3869_p9 = pnand %p3868_p7, %p3862_p0 }
  0xe8   : > { %3872 = shalt.err (!%p3869_p9)
}
  0xe9   : > { %s3873_s30 = scalar_lea.vmem %s4339_s19, 16  ;;  %s3982_s15 = smov [#allocation3]  }
  0xea   : > { %p3874_p4 = scmp.ne.s32.totalorder %s4339_s19, %s3873_s30  ;;  %s3878_s14 = sshll.u32 %s3982_s15, 4  ;;  %s3879_s14 = int_to_ptr.vmem [resolvable:$false] %s3878_s14 }
  0xeb   : > { %s3880_s6 = scalar_lea.vmem %s3879_s14, 32  ;;  %p3881_p10 = scmp.lt.s32.totalorder %s4339_s19, %s3879_s14 }
  0xec   : > { %p3876_p13 = pnand %p3874_p4, %p3860_p8  ;;  %p3882_p1 = scmp.lt.s32.totalorder %s3880_s6, %s3873_s30 }
  0xee   : > { %p3877_p11 = pneg %p3876_p13  ;;  %p3883_p3 = por %p3882_p1, %p3881_p10 }
  0xf0   : > { %p3884_p2 = pnand %p3883_p3, %p3877_p11 }
  0xf2   : > { %3887 = shalt.err (!%p3884_p2)
}
  0xf3   : > { %3512 = dma.hbm_to_vmem [thread:$0]  (!%p4343_p12), %s4337_s3, 16, %s4339_s19, %s543_s4  }
  0xf4   : > { %p4960_p0 = scmp.ne.s32.totalorder %s4949_s28, 0 }
  0xf5   : > { %s4375_s12 = sand.u32 (!%p4960_p0), 1, %s3962_s22  }
  0xf6   : > { %561 = sbr.rel (%p4960_p0) target bundleno = 1933 (0x78d), region = 84  ;;  %s564_s25 = scalar_lea.sflag (!%p4960_p0), [#allocation4], %s4375_s12 }
  0xfd   : > { %3933 = dma.done.wait (%p4318_p6), %s564_s25, 16  }
  0xfe   : > { %3935 = vsyncadd (%p4318_p6), %s564_s25, 4294967280  ;;  %p4961_p10 = scmp.eq.s32.totalorder %s4095_s27, 0 }
 0x100   : > { %3937 = dma.done.wait (%p4961_p10), [#allocation7], 32   ;;  %p4962_p11 = pmov %p4961_p10 }
 0x101   : > { %p4963_p12 = pmov %p4961_p10 }
 0x102   : > { %3939 = vsyncadd (%p4962_p11), [#allocation7], 4294967264 }
 0x103   : > { %3941 = dma.done.wait (%p4963_p12), [#allocation10], 6176   ;;  %p4964_p8 = pmov %p4961_p10 }
 0x105   : > { %3943 = vsyncadd (%p4964_p8), [#allocation10], 4294961120  ;;  %p4965_p5 = pmov %p4964_p8 }
 0x107   : > { %3945 = dma.done.wait (%p4965_p5), [#allocation13], 32   ;;  %p4966_p7 = pmov %p4965_p5 }
 0x108   : > { %p4967_p6 = pmov %p4965_p5 }
 0x109   : > { %3947 = vsyncadd (%p4966_p7), [#allocation13], 4294967264 }
 0x10a   : > { %3949 = dma.done.wait (%p4967_p6), [#allocation16], 32   ;;  %p4968_p9 = pmov %p4965_p5 }
 0x10b   : > { %p651_p4 = scmp.lt.s32.totalorder %s4095_s27, 1  ;;  %v3983_v0 = vmov 0.0|0.0   ;;  %s4969_s18 = sld [smem:[#allocation25_spill]]  ;;  %v2571_v1 = vld [vmem:[%s4917_s2 + $0x40] sm:$0xff]  ;;  %v2572_v2 = vld [vmem:[%s4917_s2 + $0x48] sm:$0xff]  ;;  %v2573_v3 = vld [vmem:[%s4917_s2 + $0x50] sm:$0xff] }
 0x10c   : > { %3951 = vsyncadd (%p4968_p9), [#allocation16], 4294967264  ;;  %3215 = vmatprep.subr.bf16.mxu1 %v3983_v0  ;;  %v3167_v4 = vpack.c.bf16 %v2572_v2, %v2571_v1  ;;  %v2574_v5 = vld [vmem:[%s4917_s2 + $0x58] sm:$0xff]  ;;  %v2575_v7 = vld [vmem:[%s4917_s2 + $0x60] sm:$0xff]  ;;  %vm700_vm0 = vcmask 1046528   ;;  %vm710_vm1 = vcmask 523264  }
 0x10d   : > { %s652_s28 = scalar_select %p651_p4, %s4095_s27, 1  ;;  %v3171_v6 = vpack.c.bf16 %v2574_v5, %v2573_v3  ;;  %v2576_v8 = vld [vmem:[%s4917_s2 + $0x68] sm:$0xff]  ;;  %v2577_v14 = vld [vmem:[%s4917_s2 + $0x70] sm:$0xff]  ;;  %v2578_v15 = vld [vmem:[%s4917_s2 + $0x78] sm:$0xff]  ;;  %vm906_vm2 = vcmask 1045504   ;;  %vm3984_vm3 = vmmov 0  }
 0x10e   : > { %3168 = vmatprep.subr.bf16.mxu0 %v3167_v4  ;;  %v3175_v13 = vpack.c.bf16 %v2576_v8, %v2575_v7  ;;  %v678_v17 = vld [vmem:[%s4917_s2] sm:$0xff]  ;;  %v679_v18 = vld [vmem:[%s4917_s2 + $0x8] sm:$0xff]  ;;  %v3179_v19 = vpack.c.bf16 %v2578_v15, %v2577_v14  ;;  %s4970_s3 = sld [smem:[#allocation31_spill]]  ;;  %v680_v32 = vld [vmem:[%s4917_s2 + $0x10] sm:$0xff]  ;;  %s4972_s30 = sld [smem:[#allocation32_spill]]  ;;  %vm1195_vm4 = vcmask 64512  }
 0x10f   : > { %s3447_s16 = smul.u32 40, %s652_s28  ;;  %3170 = vmatpush3.bf16.msra.mxu0 %v3167_v4  ;;  %v3183_v28 = vpack.c.bf16 %v679_v18, %v678_v17  ;;  %v681_v33 = vld [vmem:[%s4917_s2 + $0x18] sm:$0xff]  ;;  %v682_v38 = vld [vmem:[%s4917_s2 + $0x20] sm:$0xff]  ;;  %v683_v39 = vld [vmem:[%s4917_s2 + $0x28] sm:$0xff]  ;;  %s4973_s6 = sld [smem:[#allocation29_spill]]  ;;  %vm1443_vm5 = vcmask 261120  }
 0x110   : > { %3172 = vmatprep.subr.bf16.mxu0 %v3171_v6  ;;  %v3187_v36 = vpack.c.bf16 %v681_v33, %v680_v32  ;;  %v3191_v41 = vpack.c.bf16 %v683_v39, %v682_v38  ;;  %v684_v42 = vld [vmem:[%s4917_s2 + $0x30] sm:$0xff]  ;;  %v685_v43 = vld [vmem:[%s4917_s2 + $0x38] sm:$0xff]  ;;  %v2587_v45 = vld [vmem:[%s4917_s2 + $0x80] sm:$0xff]  ;;  %s4975_s1 = sld [smem:[#allocation30_spill]]  ;;  %s2569_s25 = sshll.u32 %s4375_s12, 5 }
 0x111   : > { %s4405_s4 = scalar_lea.vmem %s4969_s18, %s3447_s16  ;;  %v3195_v44 = vpack.c.bf16 %v685_v43, %v684_v42  ;;  %v2588_v46 = vld [vmem:[%s4917_s2 + $0x88] sm:$0xff]  ;;  %v2589_v48 = vld [vmem:[%s4917_s2 + $0x90] sm:$0xff]  ;;  %v2590_v49 = vld [vmem:[%s4917_s2 + $0x98] sm:$0xff]  ;;  %s4971_s18 = sld [smem:[#allocation27_spill]] }
 0x112   : > { %v4426_v9 = vld [vmem:[%s4405_s4] sm:$0xff]  ;;  %v4429_v10 = vld [vmem:[%s4405_s4 + $0x8] sm:$0xff]  ;;  %v4451_v20 = vld [vmem:[%s4405_s4 + $0x10] sm:$0xff]  ;;  %v3199_v47 = vpack.c.bf16 %v2588_v46, %v2587_v45  ;;  %v3203_v50 = vpack.c.bf16 %v2590_v49, %v2589_v48  ;;  %s650_s28 = scalar_lea.vmem [#allocation18], %s2569_s25  ;;  %s4976_s20 = sld [smem:[#allocation33_spill]] }
 0x113   : > { %v701_v11 = vrot.slane %v4426_v9, 1  ;;  %v702_v12 = vrot.slane %v4429_v10, 1  ;;  %3174 = vmatpush3.bf16.msra.mxu0 %v3171_v6  ;;  %v4454_v21 = vld [vmem:[%s4405_s4 + $0x18] sm:$0xff]  ;;  %v704_v27 = vrot.slane %v4451_v20, 1  ;;  %v4473_v30 = vld [vmem:[%s4405_s4 + $0x20] sm:$0x3] }
 0x114   : > { %3176 = vmatprep.subr.bf16.mxu0 %v3175_v13  ;;  %v656_v22 = vld [vmem:[%s4970_s3] sm:$0xff]  ;;  %v657_v23 = vld [vmem:[%s4970_s3 + $0x8] sm:$0xff]  ;;  %v658_v24 = vld [vmem:[%s4970_s3 + $0x10] sm:$0xff]  ;;  %v706_v29 = vrot.slane %v4454_v21, 1  ;;  %v708_v35 = vrot.slane %v4473_v30, 1  ;;  %v907_v51 = vrot.slane %v4426_v9, 2 }
 0x115   : > { %v4440_v16 = vsel %vm700_vm0, %v701_v11, %v702_v12  ;;  %v659_v25 = vld [vmem:[%s4970_s3 + $0x18] sm:$0xff]  ;;  %v4468_v26 = vpack.c.bf16 %v657_v23, %v656_v22  ;;  %v4486_v34 = vsel %vm700_vm0, %v702_v12, %v704_v27  ;;  %v908_v52 = vrot.slane %v4429_v10, 2  ;;  %v2591_v53 = vld [vmem:[%s4917_s2 + $0xa0] sm:$0xff]  ;;  %v2592_v54 = vld [vmem:[%s4917_s2 + $0xa8] sm:$0xff]  ;;  %s4974_s4 = scalar_lea.vmem [#allocation3], %s4375_s12  ;;  %s2390_s16 = sshll.u32 %s650_s28, 4  ;;  %s4865_s16 = int_to_ptr.vmem [resolvable:$true] %s2390_s16 }
 0x116   : > { %2821 = vmatprep.mubr.msk.f32.mxu0 %vm710_vm1, %v4440_v16  ;;  %v4476_v31 = vpack.c.bf16 %v659_v25, %v658_v24  ;;  %v4490_v37 = vsel %vm700_vm0, %v704_v27, %v706_v29  ;;  %v4505_v40 = vsel %vm700_vm0, %v706_v29, %v708_v35  ;;  %v3207_v55 = vpack.c.bf16 %v2592_v54, %v2591_v53  ;;  %v2593_v57 = vld [vmem:[%s4917_s2 + $0xb0] sm:$0xff]  ;;  %v2594_v58 = vld [vmem:[%s4917_s2 + $0xb8] sm:$0xff]  ;;  %v660_v3 = vld [vmem:[%s4970_s3 + $0x20] sm:$0xff]  ;;  %s3888_s15 = scalar_lea.vmem %s4865_s16, 512  ;;  %p4977_p1 = scmp.ne.s32.totalorder %s4956_s26, 0 }
 0x117   : > { %3178 = vmatpush3.bf16.msra.mxu0 %v3175_v13  ;;  %3217 = vmatpush3.bf16.msra.mxu1 %v4468_v26  ;;  %v909_v56 = vsel %vm906_vm2, %v907_v51, %v908_v52  ;;  %v3211_v59 = vpack.c.bf16 %v2594_v58, %v2593_v57  ;;  %v910_v60 = vrot.slane %v4451_v20, 2  ;;  %v912_v61 = vrot.slane %v4454_v21, 2  ;;  %v661_v4 = vld [vmem:[%s4970_s3 + $0x28] sm:$0xff]  ;;  %v662_v6 = vld [vmem:[%s4970_s3 + $0x30] sm:$0xff]  ;;  %v663_v7 = vld [vmem:[%s4970_s3 + $0x38] sm:$0xff]  ;;  %p3889_p13 = scmp.ne.s32.totalorder %s4865_s16, %s3888_s15  ;;  %s3986_s14 = smov [#allocation18]  }
 0x118   : > { %3180 = vmatprep.subr.bf16.mxu0 %v3179_v19  ;;  %3218 = vmatprep.subr.bf16.mxu1 %v3983_v0  ;;  %v914_v63 = vrot.slane %v4473_v30, 2  ;;  %v4566_v5 = vpack.c.bf16 %v661_v4, %v660_v3  ;;  %v4576_v8 = vpack.c.bf16 %v663_v7, %v662_v6  ;;  %v666_v12 = vld [vmem:[%s4970_s3 + $0x50] sm:$0xff]  ;;  %v667_v13 = vld [vmem:[%s4970_s3 + $0x58] sm:$0xff]  ;;  %v668_v15 = vld [vmem:[%s4970_s3 + $0x60] sm:$0xff]  ;;  %v3985_v22 = vmov 0.0   ;;  %s3892_s25 = sshll.u32 %s3986_s14, 4  ;;  %s3893_s25 = int_to_ptr.vmem [resolvable:$false] %s3892_s25 }
 0x119   : > { %v911_v62 = vsel %vm906_vm2, %v908_v52, %v910_v60  ;;  %v913_v1 = vsel %vm906_vm2, %v910_v60, %v912_v61  ;;  %v4596_v14 = vpack.c.bf16 %v667_v13, %v666_v12  ;;  %v669_v17 = vld [vmem:[%s4970_s3 + $0x68] sm:$0xff]  ;;  %2903 = vmatprep.mubr.msk.f32.mxu1 %vm3984_vm3, %v3985_v22  ;;  %1534 = vst [vmem:[#allocation2] sm:$0x1] %v3985_v22  ;;  %1535 = vst [vmem:[#allocation2 + $0x21] sm:$0x1] %v3985_v22  ;;  %v1423_v12 = vld [vmem:[%s4973_s6] sm:$0xff]  ;;  %p3890_p3 = pnand %p3889_p13, %p4977_p1  ;;  %p3895_p0 = scmp.lt.s32.totalorder %s4865_s16, %s3893_s25 }
 0x11a   : > { %v915_v2 = vsel %vm906_vm2, %v912_v61, %v914_v63  ;;  %v4606_v18 = vpack.c.bf16 %v669_v17, %v668_v15  ;;  %v2599_v23 = vld [vmem:[%s4971_s18] ss:$0 sm:$0xff]  ;;  %v1424_v60 = vld [vmem:[%s4973_s6 + $0x8] sm:$0xff]  ;;  %v1426_v61 = vld [vmem:[%s4973_s6 + $0x18] sm:$0xff] }
 0x11b   : > { %3182 = vmatpush3.bf16.msra.mxu0 %v3179_v19  ;;  %3220 = vmatpush3.bf16.msra.mxu1 %v4476_v31  ;;  %v670_v19 = vld [vmem:[%s4970_s3 + $0x70] sm:$0xff]  ;;  %v1428_v15 = vld [vmem:[%s4973_s6 + $0x28] sm:$0xff]  ;;  %v1430_v17 = vld [vmem:[%s4973_s6 + $0x38] sm:$0xff]  ;;  %p3891_p2 = pneg %p3890_p3 }
 0x11c   : > { %3184 = vmatprep.subr.bf16.mxu0 %v3183_v28  ;;  %3221 = vmatprep.subr.bf16.mxu1 %v3983_v0  ;;  %v1425_v13 = vld [vmem:[%s4973_s6 + $0x10] sm:$0xff] }
 0x11e   : > { %2822 = vmatmul.mubr.msk.f32.vlgmr.msra.gmra.mrb[0].mxu0 %vm710_vm1, %v4486_v34 }
 0x11f   : > { %3186 = vmatpush3.bf16.msra.mxu0 %v3183_v28  ;;  %2824 = vmatprep.mubr.msk.f32.mxu0 %vm710_vm1, %v4490_v37 }
 0x120   : > { %3188 = vmatprep.subr.bf16.mxu0 %v3187_v36  ;;  %3223 = vmatpush3.bf16.msra.mxu1 %v4566_v5 }
 0x121   : > { %3224 = vmatprep.subr.bf16.mxu1 %v3983_v0 }
 0x122   : > { %2825 = vmatmul.mubr.msk.f32.gmra.mrb[2].mxu0 %vm710_vm1, %v4505_v40 }
 0x123   : > { %3190 = vmatpush3.bf16.msra.mxu0 %v3187_v36  ;;  %2843 = vmatprep.mubr.msk.f32.mxu0 %vm710_vm1, %v4426_v9  ;;  %v664_v9 = vld [vmem:[%s4970_s3 + $0x40] sm:$0xff] }
 0x124   : > { %3192 = vmatprep.subr.bf16.mxu0 %v3191_v41  ;;  %3226 = vmatpush3.bf16.msra.mxu1 %v4576_v8 }
 0x125   : > { %3227 = vmatprep.subr.bf16.mxu1 %v3983_v0 }
 0x127   : > { %3194 = vmatpush3.bf16.msra.mxu0 %v3191_v41 }
 0x128   : > { %3196 = vmatprep.subr.bf16.mxu0 %v3195_v44 }
 0x12b   : > { %3198 = vmatpush3.bf16.msra.mxu0 %v3195_v44 }
 0x12c   : > { %3200 = vmatprep.subr.bf16.mxu0 %v3199_v47 }
 0x12e   : > { %2844 = vmatmul.mubr.msk.f32.vlgmr.msra.gmra.mrb[0].mxu0 %vm710_vm1, %v4429_v10  ;;  %v665_v10 = vld [vmem:[%s4970_s3 + $0x48] sm:$0xff] }
 0x12f   : > { %3202 = vmatpush3.bf16.msra.mxu0 %v3199_v47  ;;  %2846 = vmatprep.mubr.msk.f32.mxu0 %vm710_vm1, %v4451_v20  ;;  %v4586_v11 = vpack.c.bf16 %v665_v10, %v664_v9  ;;  %v671_v20 = vld [vmem:[%s4970_s3 + $0x78] sm:$0xff] }
 0x130   : > { %3204 = vmatprep.subr.bf16.mxu0 %v3203_v50 }
 0x131   : > { %3229 = vmatpush3.bf16.msra.mxu1 %v4586_v11 }
 0x132   : > { %2847 = vmatmul.mubr.msk.f32.gmra.mrb[2].mxu0 %vm710_vm1, %v4454_v21  ;;  %3230 = vmatprep.subr.bf16.mxu1 %v3983_v0  ;;  %v4616_v21 = vpack.c.bf16 %v671_v20, %v670_v19  ;;  %v3265_v19 = vpack.c.bf16 %v1425_v13, %v1423_v12  ;;  %v3267_v20 = vpack.c.bf16 %v1430_v17, %v1428_v15 }
 0x133   : > { %3206 = vmatpush3.bf16.msra.mxu0 %v3203_v50  ;;  %2865 = vmatprep.mubr.msk.f32.mxu0 %vm710_vm1, %v909_v56 }
 0x134   : > { %3208 = vmatprep.subr.bf16.mxu0 %v3207_v55 }
 0x135   : > { %3232 = vmatpush3.bf16.msra.mxu1 %v4596_v14 }
 0x136   : > { %3233 = vmatprep.subr.bf16.mxu1 %v3983_v0 }
 0x137   : > { %3210 = vmatpush3.bf16.msra.mxu0 %v3207_v55 }
 0x138   : > { %3212 = vmatprep.subr.bf16.mxu0 %v3211_v59 }
 0x139   : > { %3235 = vmatpush3.bf16.msra.mxu1 %v4606_v18 }
 0x13a   : > { %3236 = vmatprep.subr.bf16.mxu1 %v3983_v0 }
 0x13b   : > { %3214 = vmatpush3.bf16.msra.mxu0 %v3211_v59  ;;  %v4670_v59 = vld [vmem:[%s4972_s30] sm:$0xff] }
 0x13c   : > { %2941 = vmatprep.subr.mxu0 %v3985_v22 }
 0x13d   : > { %3238 = vmatpush3.bf16.msra.mxu1 %v4616_v21 }
 0x13e   : > { %2866 = vmatmul.mubr.msk.f32.vlgmr.msra.gmra.mrb[0].mxu0 %vm710_vm1, %v911_v62  ;;  %3239 = vmatprep.subr.bf16.mxu1 %v3983_v0 }
 0x13f   : > { %2868 = vmatprep.mubr.msk.f32.mxu0 %vm710_vm1, %v913_v1  ;;  %2942 = vmatpush3.msra.mxu0 %v4670_v59 }
 0x140   : > { %2946 = vmatprep.subr.mxu0 %v3985_v22 }
 0x142   : > { %2869 = vmatmul.mubr.msk.f32.gmra.mrb[2].mxu0 %vm710_vm1, %v915_v2  ;;  %v3263_v2 = vpack.c.bf16 %v1426_v61, %v1424_v60  ;;  %v1580_v60 = vld [vmem:[#allocation11 + $0xf8] sm:$0xff] }
 0x143   : > { %2943 = vmatprep.mubr.msk.f32.mxu0 %vm3984_vm3, %v3985_v22 }
 0x211   : > { %v2867_v24 = vpop.f32.mrb[0].mxu0 }
 0x212   : > { %v990_v25 = vpop.f32.mrb[1].mxu0  ;;  %v4630_v27 = vadd.f32 %v2867_v24, %v2599_v23  ;;  %v1429_v24 = vld [vmem:[%s4973_s6 + $0x30] sm:$0xff] }
 0x213   : > { %v4632_v28 = vadd.f32 %v2599_v23, %v990_v25 }
 0x214   : > { %v1036_v44 = vmul.f32 %v4630_v27, %v4630_v27 }
 0x215   : > { %v2870_v29 = vpop.f32.mrb[2].mxu0  ;;  %v1026_v32 = vadd.f32 %v4630_v27, %v4632_v28  ;;  %v1035_v45 = vmul.f32 %v4632_v28, %v4632_v28 }
 0x216   : > { %v1000_v30 = vpop.f32.mrb[3].mxu0  ;;  %v4638_v35 = vadd.f32 %v2870_v29, %v2599_v23 }
 0x217   : > { %v4636_v33 = vadd.f32 %v2599_v23, %v1000_v30  ;;  %v1039_v49 = vadd.f32 %v1036_v44, %v1035_v45  ;;  %v1427_v23 = vld [vmem:[%s4973_s6 + $0x20] sm:$0xff]  ;;  %v1570_v44 = vld [vmem:[#allocation11 + $0xa8] sm:$0xff] }
 0x218   : > { %v1038_v51 = vmul.f32 %v4638_v35, %v4638_v35  ;;  %v3269_v29 = vpack.c.bf16 %v1429_v24, %v1427_v23  ;;  %v1422_v30 = vld [vmem:[%s4974_s4] sm:$0x1]  ;;  %v2602_v23 = vld [vmem:[#allocation6] ss:$0 sm:$0xff]  ;;  %s2620_s4 = sshll.u32 %s4095_s27, 9  ;;  %s2377_s27 = scalar_lea.sflag [#allocation5], %s4375_s12 }
 0x219   : > { %v1027_v36 = vadd.f32 %v1026_v32, %v4636_v33  ;;  %v1037_v47 = vmul.f32 %v4636_v33, %v4636_v33  ;;  %v1565_v32 = vld [vmem:[#allocation11 + $0x80] sm:$0xff]  ;;  %s4871_s30 = scalar_lea.hbm %s4976_s20, %s2620_s4 }
 0x21b   : > { %v1028_v38 = vadd.f32 %v1027_v36, %v4638_v35  ;;  %v1040_v50 = vadd.f32 %v1039_v49, %v1037_v47  ;;  %v1566_v36 = vld [vmem:[#allocation11 + $0x88] sm:$0xff]  ;;  %v1572_v47 = vld [vmem:[#allocation11 + $0xb8] sm:$0xff]  ;;  %v1573_v49 = vld [vmem:[#allocation11 + $0xc0] sm:$0xff] }
 0x21d   : > { %v1029_v39 = vrot.slane %v1028_v38, 4  ;;  %v1041_v52 = vadd.f32 %v1040_v50, %v1038_v51  ;;  %v1574_v50 = vld [vmem:[#allocation11 + $0xc8] sm:$0xff] }
 0x21e   : > { %v3287_v51 = vpack.c.bf16 %v1574_v50, %v1573_v49 }
 0x21f   : > { %v1030_v41 = vadd.f32 %v1029_v39, %v1028_v38  ;;  %v1042_v53 = vrot.slane %v1041_v52, 4  ;;  %v3271_v38 = vpack.c.bf16 %v1566_v36, %v1565_v32  ;;  %v1567_v39 = vld [vmem:[#allocation11 + $0x90] sm:$0xff]  ;;  %v2603_v32 = vld [vmem:[#allocation8] ss:$0 sm:$0xff] }
 0x221   : > { %v1031_v42 = vrot.slane %v1030_v41, 2  ;;  %v1043_v54 = vadd.f32 %v1042_v53, %v1041_v52  ;;  %v1575_v52 = vld [vmem:[#allocation11 + $0xd0] sm:$0xff]  ;;  %v1576_v53 = vld [vmem:[#allocation11 + $0xd8] sm:$0xff] }
 0x223   : > { %v1032_v43 = vadd.f32 %v1031_v42, %v1030_v41  ;;  %v1044_v55 = vrot.slane %v1043_v54, 2  ;;  %v1568_v41 = vld [vmem:[#allocation11 + $0x98] sm:$0xff] }
 0x224   : > { %v3275_v42 = vpack.c.bf16 %v1568_v41, %v1567_v39 }
 0x225   : > { %v1033_v46 = vrot.slane %v1032_v43, 1  ;;  %v1045_v56 = vadd.f32 %v1044_v55, %v1043_v54  ;;  %v3291_v54 = vpack.c.bf16 %v1576_v53, %v1575_v52  ;;  %v1577_v55 = vld [vmem:[#allocation11 + $0xe0] sm:$0xff] }
 0x227   : > { %v1034_v48 = vadd.f32 %v1033_v46, %v1032_v43  ;;  %v1046_v57 = vrot.slane %v1045_v56, 1  ;;  %v1569_v43 = vld [vmem:[#allocation11 + $0xa0] sm:$0xff]  ;;  %v1571_v46 = vld [vmem:[#allocation11 + $0xb0] sm:$0xff] }
 0x228   : > { %v3279_v45 = vpack.c.bf16 %v1570_v44, %v1569_v43 }
 0x229   : > { %2904 = vmatmul.mubr.f32.vlgmr.msra.gmra.mrb[0].mxu1 %v1034_v48  ;;  %v1047_v58 = vadd.f32 %v1046_v57, %v1045_v56  ;;  %v3283_v48 = vpack.c.bf16 %v1572_v47, %v1571_v46  ;;  %v1578_v56 = vld [vmem:[#allocation11 + $0xe8] sm:$0xff] }
 0x22a   : > { %3241 = vmatpush3.bf16.msra.mxu1 %v4468_v26  ;;  %2938 = vmatprep.mubr.msk.f32.mxu1 %vm3984_vm3, %v3985_v22  ;;  %v3295_v57 = vpack.c.bf16 %v1578_v56, %v1577_v55 }
 0x22b   : > { %3242 = vmatprep.subr.bf16.mxu1 %v3983_v0 }
 0x22e   : > { %3244 = vmatpush3.bf16.msra.mxu1 %v4476_v31 }
 0x22f   : > { %3245 = vmatprep.subr.bf16.mxu1 %v3983_v0 }
 0x232   : > { %3247 = vmatpush3.bf16.msra.mxu1 %v4566_v5 }
 0x233   : > { %3248 = vmatprep.subr.bf16.mxu1 %v3983_v0 }
 0x236   : > { %3250 = vmatpush3.bf16.msra.mxu1 %v4576_v8 }
 0x237   : > { %3251 = vmatprep.subr.bf16.mxu1 %v3983_v0 }
 0x23a   : > { %3253 = vmatpush3.bf16.msra.mxu1 %v4586_v11 }
 0x23b   : > { %3254 = vmatprep.subr.bf16.mxu1 %v3983_v0 }
 0x23e   : > { %3256 = vmatpush3.bf16.msra.mxu1 %v4596_v14 }
 0x23f   : > { %3257 = vmatprep.subr.bf16.mxu1 %v3983_v0 }
 0x242   : > { %3259 = vmatpush3.bf16.msra.mxu1 %v4606_v18 }
 0x243   : > { %3260 = vmatprep.subr.bf16.mxu1 %v3983_v0 }
 0x246   : > { %3262 = vmatpush3.bf16.msra.mxu1 %v4616_v21 }
 0x247   : > { %3272 = vmatprep.subr.bf16.mxu1 %v3271_v38 }
 0x249   : > { %2939 = vmatmul.mubr.f32.vlgmr.msra.gmra.mrb[2].mxu1 %v1047_v58  ;;  %v1579_v58 = vld [vmem:[#allocation11 + $0xf0] sm:$0xff] }
 0x24a   : > { %3274 = vmatpush3.bf16.msra.mxu1 %v3271_v38  ;;  %v3299_v61 = vpack.c.bf16 %v1580_v60, %v1579_v58 }
 0x24b   : > { %3276 = vmatprep.subr.bf16.mxu1 %v3275_v42 }
 0x24e   : > { %3278 = vmatpush3.bf16.msra.mxu1 %v3275_v42 }
 0x24f   : > { %3280 = vmatprep.subr.bf16.mxu1 %v3279_v45 }
 0x252   : > { %3282 = vmatpush3.bf16.msra.mxu1 %v3279_v45 }
 0x253   : > { %3284 = vmatprep.subr.bf16.mxu1 %v3283_v48 }
 0x256   : > { %3286 = vmatpush3.bf16.msra.mxu1 %v3283_v48 }
 0x257   : > { %3288 = vmatprep.subr.bf16.mxu1 %v3287_v51 }
 0x25a   : > { %3290 = vmatpush3.bf16.msra.mxu1 %v3287_v51 }
 0x25b   : > { %3292 = vmatprep.subr.bf16.mxu1 %v3291_v54 }
 0x25e   : > { %3294 = vmatpush3.bf16.msra.mxu1 %v3291_v54 }
 0x25f   : > { %3296 = vmatprep.subr.bf16.mxu1 %v3295_v57 }
 0x262   : > { %3298 = vmatpush3.bf16.msra.mxu1 %v3295_v57 }
 0x263   : > { %3300 = vmatprep.subr.bf16.mxu1 %v3299_v61 }
 0x266   : > { %3302 = vmatpush3.bf16.msra.mxu1 %v3299_v61 }
 0x2fc   : > { %v1114_v62 = vpop.f32.mrb[0].mxu1 }
 0x2fd   : > { %v1119_v63 = vmul.f32 0.001953125, %v1114_v62  ;;  %v2905_v1 = vpop.f32.mrb[1].mxu1  ;;  %v1544_v62 = vld [vmem:[#allocation11] sm:$0xff] }
 0x2ff   : > { %2944 = vmatmul.mubr.msk.f32.vlgmr.msra.gmra.mrb[4].mxu0 %vm1195_vm4, %v1119_v63  ;;  %v1191_v4 = vmul.f32 %v1119_v63, %v1119_v63  ;;  %v1545_v63 = vld [vmem:[#allocation11 + $0x8] sm:$0xff] }
 0x300   : > { %2947 = vmatpush3.msra.mxu0 %v4670_v59  ;;  %2948 = vmatprep.mubr.msk.f32.mxu0 %vm3984_vm3, %v3985_v22  ;;  %v4725_v1 = vpack.c.bf16 %v1545_v63, %v1544_v62 }
 0x301   : > { %3264 = vmatprep.subr.bf16.mxu0 %v3263_v2 }
 0x302   : > { %3304 = vmatprep.subr.bf16.mxu1 %v4725_v1 }
 0x31c   : > { %v1186_v3 = vpop.f32.mrb[2].mxu1 }
 0x31d   : > { %v1190_v6 = vmul.f32 0.001953125, %v1186_v3  ;;  %v2940_v7 = vpop.f32.mrb[3].mxu1 }
 0x31f   : > { %v1192_v9 = vsub.f32 %v1190_v6, %v1191_v4  ;;  %v1342_v4 = vlaneseq }
 0x321   : > { %v1193_v10 = vadd.f32 1e-05, %v1192_v9  ;;  %v4728_v6 = vshrl.u32 %v1342_v4, 7 }
 0x323   : > { %3582 = vrsqrt.f32 %v1193_v10  ;;  %v4731_v7 = vsub.s32 0, %v4728_v6 }
 0x32d   : > { %v3583_v25 = vpop.eup %3582 }
 0x32e   : > { %2949 = vmatmul.mubr.msk.f32.vlgmr.msra.gmra.mrb[6].mxu0 %vm1195_vm4, %v3583_v25 }
 0x32f   : > { %3266 = vmatpush1.bf16.msra.mxu0 %v3265_v19  ;;  %1511 = vmatprep.mubr.f32.mxu0 %v3985_v22 }
 0x330   : > { %3268 = vmatprep.subr.bf16.mxu0 %v3267_v20 }
 0x333   : > { %3270 = vmatpush1.bf16.msra.mxu0 %v3269_v29 }
 0x334   : > { %3367 = vmatprep.subr.bf16.mxu0 %v3983_v0 }
 0x336   : > { %2604 = vmatmul.mubr.msk.f32.vlgmr.msra.gmra.mrb[8].mxu0 %vm1443_vm5, %v1422_v30 }
 0x337   : > { %3369 = vmatpush3.bf16.msra.mxu0 %v4468_v26  ;;  %3097 = vmatprep.mubr.msk.f32.mxu0 %vm3984_vm3, %v3985_v22 }
 0x338   : > { %3370 = vmatprep.subr.bf16.mxu0 %v3983_v0 }
 0x33b   : > { %3372 = vmatpush3.bf16.msra.mxu0 %v4476_v31 }
 0x33c   : > { %3373 = vmatprep.subr.bf16.mxu0 %v3983_v0 }
 0x33f   : > { %3375 = vmatpush3.bf16.msra.mxu0 %v4566_v5 }
 0x340   : > { %3376 = vmatprep.subr.bf16.mxu0 %v3983_v0 }
 0x343   : > { %3378 = vmatpush3.bf16.msra.mxu0 %v4576_v8 }
 0x344   : > { %3379 = vmatprep.subr.bf16.mxu0 %v3983_v0 }
 0x347   : > { %3381 = vmatpush3.bf16.msra.mxu0 %v4586_v11 }
 0x348   : > { %3382 = vmatprep.subr.bf16.mxu0 %v3983_v0 }
 0x34b   : > { %3384 = vmatpush3.bf16.msra.mxu0 %v4596_v14 }
 0x34c   : > { %3385 = vmatprep.subr.bf16.mxu0 %v3983_v0 }
 0x34f   : > { %3387 = vmatpush3.bf16.msra.mxu0 %v4606_v18 }
 0x350   : > { %3388 = vmatprep.subr.bf16.mxu0 %v3983_v0 }
 0x353   : > { %3390 = vmatpush3.bf16.msra.mxu0 %v4616_v21 }
 0x354   : > { %3391 = vmatprep.subr.bf16.mxu0 %v3983_v0 }
 0x3d2   : > { %v1265_v2 = vpop.f32.mrb[4].mxu0 }
 0x3d3   : > { %v2945_v3 = vpop.f32.mrb[5].mxu0  ;;  %v1345_v9 = vrot.slane %v1265_v2, %v4731_v7 }
 0x3d5   : > { %v1346_v10 = vsub.f32 %v4632_v28, %v1345_v9  ;;  %v1347_v13 = vsub.f32 %v4630_v27, %v1345_v9  ;;  %v1348_v15 = vsub.f32 %v4636_v33, %v1345_v9  ;;  %v1349_v17 = vsub.f32 %v4638_v35, %v1345_v9 }
 0x401   : > { %v1338_v12 = vpop.f32.mrb[6].mxu0 }
 0x402   : > { %v1353_v19 = vrot.slane %v1338_v12, %v4731_v7  ;;  %v2950_v20 = vpop.f32.mrb[7].mxu0 }
 0x404   : > { %v1354_v24 = vmul.f32 %v1353_v19, %v1346_v10  ;;  %v1355_v25 = vmul.f32 %v1353_v19, %v1347_v13  ;;  %v1356_v29 = vmul.f32 %v1353_v19, %v1348_v15  ;;  %v1357_v30 = vmul.f32 %v1353_v19, %v1349_v17 }
 0x406   : > { %v1364_v36 = vmul.f32 %v2602_v23, %v1354_v24  ;;  %v1365_v38 = vmul.f32 %v2602_v23, %v1355_v25  ;;  %v1366_v39 = vmul.f32 %v2602_v23, %v1356_v29  ;;  %v1367_v28 = vmul.f32 %v2602_v23, %v1357_v30  ;;  %v1431_v24 = vld [vmem:[#allocation9] sm:$0x3] }
 0x408   : > { %v4739_v41 = vadd.f32 %v2603_v32, %v1364_v36  ;;  %v4741_v27 = vadd.f32 %v2603_v32, %v1365_v38  ;;  %v4743_v33 = vadd.f32 %v2603_v32, %v1366_v39  ;;  %v4745_v35 = vadd.f32 %v2603_v32, %v1367_v28 }
 0x409   : > { %v1513_v42 = vpop.f32.mrb[8].mxu0  ;;  %v1436_v38 = vrot.slane %v1431_v24, %v4731_v7  ;;  %v1439_v39 = vsub.s32 1, %v4728_v6 }
 0x40a   : > { %v1515_v43 = vpop.f32.mrb[9].mxu0  ;;  %v1382_v44 = vand.u32 2147483647, %v4739_v41  ;;  %v1383_v45 = vand.u32 2147483647, %v4741_v27  ;;  %v1378_v9 = vmax.f32 %v4739_v41, 0.0 }
 0x40b   : > { %v1384_v46 = vand.u32 2147483647, %v4743_v33  ;;  %v1385_v47 = vand.u32 2147483647, %v4745_v35  ;;  %v1379_v13 = vmax.f32 %v4741_v27, 0.0  ;;  %v1380_v19 = vmax.f32 %v4743_v33, 0.0 }
 0x40c   : > { %v1386_v48 = vsub.f32 0.0, %v1382_v44  ;;  %v1387_v49 = vsub.f32 0.0, %v1383_v45  ;;  %v1381_v25 = vmax.f32 %v4745_v35, 0.0  ;;  %v1514_v28 = vadd.f32 %v1513_v42, %v1436_v38  ;;  %v1758_v38 = vld [vmem:[#allocation11 + $0x110] sm:$0xff] }
 0x40d   : > { %v1388_v50 = vsub.f32 0.0, %v1384_v46  ;;  %v1389_v51 = vsub.f32 0.0, %v1385_v47  ;;  %v1440_v44 = vrot.slane %v1431_v24, %v1439_v39  ;;  %v1558_v24 = vld [vmem:[#allocation11 + $0x70] sm:$0xff]  ;;  %v1759_v39 = vld [vmem:[#allocation11 + $0x118] sm:$0xff] }
 0x40e   : > { %v1390_v52 = vmul.f32 1.442695, %v1386_v48  ;;  %v1392_v53 = vmul.f32 1.442695, %v1387_v49  ;;  %v1521_v45 = vrot.slane %v1514_v28, %v4731_v7  ;;  %v3339_v28 = vpack.c.bf16 %v1759_v39, %v1758_v38 }
 0x40f   : > { %v1394_v54 = vmul.f32 1.442695, %v1388_v50  ;;  %v1396_v55 = vmul.f32 1.442695, %v1389_v51  ;;  %v1516_v46 = vadd.f32 %v1515_v43, %v1440_v44 }
 0x410   : > { %3584 = vpow2.f32 %v1390_v52 }
 0x411   : > { %3586 = vpow2.f32 %v1392_v53  ;;  %v1529_v6 = vrot.slane %v1516_v46, %v4731_v7  ;;  %v1761_v46 = vld [vmem:[#allocation11 + $0x128] sm:$0xff] }
 0x412   : > { %3588 = vpow2.f32 %v1394_v54 }
 0x413   : > { %3590 = vpow2.f32 %v1396_v55  ;;  %v1546_v55 = vld [vmem:[#allocation11 + $0x10] sm:$0xff] }
 0x41a   : > { %v3585_v56 = vpop.eup %3584 }
 0x41b   : > { %v3587_v57 = vpop.eup %3586  ;;  %v1398_v58 = vadd.f32 1.0, %v3585_v56  ;;  %v1547_v56 = vld [vmem:[#allocation11 + $0x18] sm:$0xff] }
 0x41c   : > { %v3589_v60 = vpop.eup %3588  ;;  %v1399_v61 = vadd.f32 1.0, %v3587_v57 }
 0x41d   : > { %v3591_v62 = vpop.eup %3590  ;;  %v1400_v63 = vadd.f32 1.0, %v3589_v60  ;;  %3592 = vlog2.f32 %v1398_v58 }
 0x41e   : > { %v1401_v2 = vadd.f32 1.0, %v3591_v62  ;;  %3594 = vlog2.f32 %v1399_v61  ;;  %v3307_v62 = vpack.c.bf16 %v1547_v56, %v1546_v55  ;;  %v1766_v56 = vld [vmem:[#allocation11 + $0x150] sm:$0xff] }
 0x41f   : > { %3596 = vlog2.f32 %v1400_v63  ;;  %v1549_v63 = vld [vmem:[#allocation11 + $0x28] sm:$0xff] }
 0x420   : > { %3598 = vlog2.f32 %v1401_v2 }
 0x427   : > { %v3593_v3 = vpop.eup %3592 }
 0x428   : > { %v3595_v4 = vpop.eup %3594  ;;  %v1403_v10 = vmul.f32 0.6931472, %v3593_v3  ;;  %v1551_v3 = vld [vmem:[#allocation11 + $0x38] sm:$0xff] }
 0x429   : > { %v3597_v12 = vpop.eup %3596  ;;  %v1405_v15 = vmul.f32 0.6931472, %v3595_v4 }
 0x42a   : > { %v3599_v17 = vpop.eup %3598  ;;  %v1407_v20 = vmul.f32 0.6931472, %v3597_v12  ;;  %v1410_v23 = vadd.f32 %v1403_v10, %v1378_v9  ;;  %v1552_v10 = vld [vmem:[#allocation11 + $0x40] sm:$0xff]  ;;  %v1553_v12 = vld [vmem:[#allocation11 + $0x48] sm:$0xff] }
 0x42b   : > { %v1409_v29 = vmul.f32 0.6931472, %v3599_v17  ;;  %v1411_v30 = vadd.f32 %v1405_v15, %v1379_v13  ;;  %v3319_v13 = vpack.c.bf16 %v1553_v12, %v1552_v10  ;;  %v1554_v15 = vld [vmem:[#allocation11 + $0x50] sm:$0xff]  ;;  %v1555_v17 = vld [vmem:[#allocation11 + $0x58] sm:$0xff] }
 0x42c   : > { %v1412_v32 = vadd.f32 %v1407_v20, %v1380_v19  ;;  %3600 = vtanh.f32 %v1410_v23  ;;  %v1556_v19 = vld [vmem:[#allocation11 + $0x60] sm:$0xff]  ;;  %v1557_v20 = vld [vmem:[#allocation11 + $0x68] sm:$0xff] }
 0x42d   : > { %v1413_v36 = vadd.f32 %v1409_v29, %v1381_v25  ;;  %3602 = vtanh.f32 %v1411_v30  ;;  %v3327_v23 = vpack.c.bf16 %v1557_v20, %v1556_v19  ;;  %v1559_v25 = vld [vmem:[#allocation11 + $0x78] sm:$0xff]  ;;  %v1756_v30 = vld [vmem:[#allocation11 + $0x100] sm:$0xff] }
 0x42e   : > { %3604 = vtanh.f32 %v1412_v32  ;;  %v3331_v29 = vpack.c.bf16 %v1559_v25, %v1558_v24  ;;  %v1757_v32 = vld [vmem:[#allocation11 + $0x108] sm:$0xff] }
 0x42f   : > { %3606 = vtanh.f32 %v1413_v36  ;;  %v3335_v36 = vpack.c.bf16 %v1757_v32, %v1756_v30 }
 0x436   : > { %v3601_v47 = vpop.eup %3600 }
 0x437   : > { %v3603_v48 = vpop.eup %3602  ;;  %v1418_v49 = vmul.f32 %v3601_v47, %v4739_v41 }
 0x438   : > { %v3605_v50 = vpop.eup %3604  ;;  %v1419_v51 = vmul.f32 %v3603_v48, %v4741_v27  ;;  %v1548_v27 = vld [vmem:[#allocation11 + $0x20] sm:$0xff] }
 0x439   : > { %v3607_v52 = vpop.eup %3606  ;;  %v1420_v53 = vmul.f32 %v3605_v50, %v4743_v33  ;;  %v1522_v54 = vmul.f32 %v1521_v45, %v1418_v49  ;;  %v3311_v33 = vpack.c.bf16 %v1549_v63, %v1548_v27  ;;  %v1762_v50 = vld [vmem:[#allocation11 + $0x130] sm:$0xff] }
 0x43a   : > { %v1421_v42 = vmul.f32 %v3607_v52, %v4745_v35  ;;  %v1523_v57 = vmul.f32 %v1521_v45, %v1419_v51  ;;  %v1550_v35 = vld [vmem:[#allocation11 + $0x30] sm:$0xff]  ;;  %v1763_v51 = vld [vmem:[#allocation11 + $0x138] sm:$0xff] }
 0x43b   : > { %v1524_v58 = vmul.f32 %v1521_v45, %v1420_v53  ;;  %v1530_v43 = vadd.f32 %v1529_v6, %v1522_v54  ;;  %v3315_v9 = vpack.c.bf16 %v1551_v3, %v1550_v35  ;;  %v3347_v53 = vpack.c.bf16 %v1763_v51, %v1762_v50  ;;  %v1764_v54 = vld [vmem:[#allocation11 + $0x140] sm:$0xff] }
 0x43c   : > { %v1525_v60 = vmul.f32 %v1521_v45, %v1421_v42  ;;  %v1531_v61 = vadd.f32 %v1529_v6, %v1523_v57  ;;  %v1760_v45 = vld [vmem:[#allocation11 + $0x120] sm:$0xff]  ;;  %v1767_v42 = vld [vmem:[#allocation11 + $0x158] sm:$0xff] }
 0x43d   : > { %v1532_v41 = vadd.f32 %v1529_v6, %v1524_v58  ;;  %1536 = vst [vmem:[#allocation2 + $0x1] sm:$0xff] %v1530_v43  ;;  %2983 = vmatprep.mubr.f32.mxu1 %v1530_v43  ;;  %v3343_v48 = vpack.c.bf16 %v1761_v46, %v1760_v45  ;;  %v3355_v57 = vpack.c.bf16 %v1767_v42, %v1766_v56  ;;  %v1768_v58 = vld [vmem:[#allocation11 + $0x160] sm:$0xff]  ;;  %v1769_v43 = vld [vmem:[#allocation11 + $0x168] sm:$0xff] }
 0x43e   : > { %v1533_v2 = vadd.f32 %v1529_v6, %v1525_v60  ;;  %1537 = vst [vmem:[#allocation2 + $0x9] sm:$0xff] %v1531_v61  ;;  %2984 = vmatmul.mubr.f32.vlgmr.msra.gmra.mrb[4].mxu1 %v1531_v61  ;;  %v1765_v6 = vld [vmem:[#allocation11 + $0x148] sm:$0xff]  ;;  %v3359_v60 = vpack.c.bf16 %v1769_v43, %v1768_v58  ;;  %v1770_v61 = vld [vmem:[#allocation11 + $0x170] sm:$0xff]  ;;  %v2275_v43 = vld [vmem:[%s4975_s1 + $0x38] sm:$0xff] }
 0x43f   : > { %1538 = vst [vmem:[#allocation2 + $0x11] sm:$0xff] %v1532_v41  ;;  %3306 = vmatpush3.bf16.msra.mxu1 %v4725_v1  ;;  %2986 = vmatprep.mubr.f32.mxu1 %v1532_v41  ;;  %v3323_v1 = vpack.c.bf16 %v1555_v17, %v1554_v15  ;;  %v3351_v55 = vpack.c.bf16 %v1765_v6, %v1764_v54  ;;  %v2270_v6 = vld [vmem:[%s4975_s1 + $0x10] sm:$0xff]  ;;  %v2273_v42 = vld [vmem:[%s4975_s1 + $0x28] sm:$0xff] }
 0x440   : > { %1539 = vst [vmem:[#allocation2 + $0x19] sm:$0xff] %v1533_v2  ;;  %3308 = vmatprep.subr.bf16.mxu1 %v3307_v62  ;;  %v2274_v58 = vld [vmem:[%s4975_s1 + $0x30] sm:$0xff] }
 0x442   : > { %2987 = vmatmul.mubr.f32.gmra.mrb[6].mxu1 %v1533_v2 }
 0x443   : > { %3310 = vmatpush3.bf16.msra.mxu1 %v3307_v62  ;;  %v1771_v62 = vld [vmem:[#allocation11 + $0x178] sm:$0xff] }
 0x444   : > { %v1540_v4 = vld [vmem:[#allocation2] sm:$0xff]  ;;  %3312 = vmatprep.subr.bf16.mxu1 %v3311_v33  ;;  %v3363_v41 = vpack.c.bf16 %v1771_v62, %v1770_v61 }
 0x445   : > { %3021 = vmatprep.mubr.f32.mxu1 %v1540_v4  ;;  %v1541_v44 = vld [vmem:[#allocation2 + $0x8] sm:$0xff] }
 0x446   : > { %v1542_v47 = vld [vmem:[#allocation2 + $0x10] sm:$0xff]  ;;  %v1751_v52 = vld [vmem:[#allocation2 + $0x2] sm:$0xff] }
 0x447   : > { %3314 = vmatpush3.bf16.msra.mxu1 %v3311_v33  ;;  %v1543_v49 = vld [vmem:[#allocation2 + $0x18] sm:$0xff]  ;;  %v1752_v27 = vld [vmem:[#allocation2 + $0xa] sm:$0xff] }
 0x448   : > { %3316 = vmatprep.subr.bf16.mxu1 %v3315_v9  ;;  %v1753_v63 = vld [vmem:[#allocation2 + $0x12] sm:$0xff]  ;;  %v1754_v2 = vld [vmem:[#allocation2 + $0x1a] sm:$0xff]  ;;  %v2605_v33 = vld [vmem:[#allocation12] ss:$0 sm:$0xff] }
 0x44b   : > { %3318 = vmatpush3.bf16.msra.mxu1 %v3315_v9 }
 0x44c   : > { %3320 = vmatprep.subr.bf16.mxu1 %v3319_v13 }
 0x44f   : > { %3322 = vmatpush3.bf16.msra.mxu1 %v3319_v13 }
 0x450   : > { %3324 = vmatprep.subr.bf16.mxu1 %v3323_v1 }
 0x453   : > { %3326 = vmatpush3.bf16.msra.mxu1 %v3323_v1 }
 0x454   : > { %3328 = vmatprep.subr.bf16.mxu1 %v3327_v23 }
 0x457   : > { %3330 = vmatpush3.bf16.msra.mxu1 %v3327_v23 }
 0x458   : > { %3332 = vmatprep.subr.bf16.mxu1 %v3331_v29 }
 0x45b   : > { %3334 = vmatpush3.bf16.msra.mxu1 %v3331_v29 }
 0x45c   : > { %3336 = vmatprep.subr.bf16.mxu1 %v3335_v36 }
 0x45e   : > { %3022 = vmatmul.mubr.f32.vlgmr.msra.gmra.mrb[4].mxu1 %v1541_v44 }
 0x45f   : > { %3024 = vmatprep.mubr.f32.mxu1 %v1542_v47  ;;  %3338 = vmatpush3.bf16.msra.mxu1 %v3335_v36 }
 0x460   : > { %3340 = vmatprep.subr.bf16.mxu1 %v3339_v28 }
 0x462   : > { %3025 = vmatmul.mubr.f32.gmra.mrb[6].mxu1 %v1543_v49 }
 0x463   : > { %3342 = vmatpush3.bf16.msra.mxu1 %v3339_v28  ;;  %3059 = vmatprep.mubr.f32.mxu1 %v1751_v52 }
 0x464   : > { %3344 = vmatprep.subr.bf16.mxu1 %v3343_v48 }
 0x467   : > { %3346 = vmatpush3.bf16.msra.mxu1 %v3343_v48 }
 0x468   : > { %3348 = vmatprep.subr.bf16.mxu1 %v3347_v53 }
 0x46b   : > { %3350 = vmatpush3.bf16.msra.mxu1 %v3347_v53 }
 0x46c   : > { %3352 = vmatprep.subr.bf16.mxu1 %v3351_v55 }
 0x46f   : > { %3354 = vmatpush3.bf16.msra.mxu1 %v3351_v55  ;;  %v2271_v55 = vld [vmem:[%s4975_s1 + $0x18] sm:$0xff] }
 0x470   : > { %3356 = vmatprep.subr.bf16.mxu1 %v3355_v57 }
 0x473   : > { %3358 = vmatpush3.bf16.msra.mxu1 %v3355_v57 }
 0x474   : > { %3360 = vmatprep.subr.bf16.mxu1 %v3359_v60 }
 0x477   : > { %3362 = vmatpush3.bf16.msra.mxu1 %v3359_v60  ;;  %v3427_v60 = vpack.c.bf16 %v2275_v43, %v2274_v58 }
 0x478   : > { %3364 = vmatprep.subr.bf16.mxu1 %v3363_v41 }
 0x47b   : > { %3366 = vmatpush3.bf16.msra.mxu1 %v3363_v41 }
 0x47e   : > { %3060 = vmatmul.mubr.f32.vlgmr.msra.gmra.mrb[4].mxu1 %v1752_v27 }
 0x47f   : > { %3062 = vmatprep.mubr.f32.mxu1 %v1753_v63 }
 0x482   : > { %3063 = vmatmul.mubr.f32.gmra.mrb[6].mxu1 %v1754_v2 }
 0x551   : > { %v3061_v35 = vpop.f32.mrb[4].mxu1 }
 0x552   : > { %v1838_v3 = vpop.f32.mrb[5].mxu1  ;;  %v4764_v4 = vadd.f32 %v3061_v35, %v2605_v33 }
 0x553   : > { %v4766_v9 = vadd.f32 %v2605_v33, %v1838_v3 }
 0x554   : > { %v1884_v29 = vmul.f32 %v4764_v4, %v4764_v4 }
 0x555   : > { %v3064_v10 = vpop.f32.mrb[6].mxu1  ;;  %v1874_v13 = vadd.f32 %v4764_v4, %v4766_v9  ;;  %v1883_v30 = vmul.f32 %v4766_v9, %v4766_v9 }
 0x556   : > { %v1848_v12 = vpop.f32.mrb[7].mxu1  ;;  %v4772_v17 = vadd.f32 %v3064_v10, %v2605_v33 }
 0x557   : > { %v4770_v15 = vadd.f32 %v2605_v33, %v1848_v12  ;;  %v1887_v39 = vadd.f32 %v1884_v29, %v1883_v30 }
 0x558   : > { %v1886_v44 = vmul.f32 %v4772_v17, %v4772_v17 }
 0x559   : > { %v1875_v1 = vadd.f32 %v1874_v13, %v4770_v15  ;;  %v1885_v36 = vmul.f32 %v4770_v15, %v4770_v15  ;;  %v2609_v13 = vld [vmem:[#allocation15] ss:$0 sm:$0xff] }
 0x55b   : > { %v1876_v19 = vadd.f32 %v1875_v1, %v4772_v17  ;;  %v1888_v28 = vadd.f32 %v1887_v39, %v1885_v36 }
 0x55d   : > { %v1877_v20 = vrot.slane %v1876_v19, 4  ;;  %v1889_v45 = vadd.f32 %v1888_v28, %v1886_v44 }
 0x55f   : > { %v1878_v23 = vadd.f32 %v1877_v20, %v1876_v19  ;;  %v1890_v46 = vrot.slane %v1889_v45, 4 }
 0x561   : > { %v1879_v24 = vrot.slane %v1878_v23, 2 }
 0x563   : > { %v1880_v25 = vadd.f32 %v1879_v24, %v1878_v23 }
 0x565   : > { %v1881_v32 = vrot.slane %v1880_v25, 1 }
 0x567   : > { %v1882_v38 = vadd.f32 %v1881_v32, %v1880_v25 }
 0x569   : > { %3098 = vmatmul.mubr.f32.vlgmr.msra.gmra.mrb[10].mxu0 %v1882_v38 }
 0x56a   : > { %3393 = vmatpush3.bf16.msra.mxu0 %v4468_v26  ;;  %3132 = vmatprep.mubr.msk.f32.mxu0 %vm3984_vm3, %v3985_v22  ;;  %v1891_v26 = vadd.f32 %v1890_v46, %v1889_v45 }
 0x56b   : > { %3394 = vmatprep.subr.bf16.mxu0 %v3983_v0 }
 0x56c   : > { %v1892_v47 = vrot.slane %v1891_v26, 2 }
 0x56e   : > { %3396 = vmatpush3.bf16.msra.mxu0 %v4476_v31  ;;  %v1893_v31 = vadd.f32 %v1892_v47, %v1891_v26 }
 0x56f   : > { %3397 = vmatprep.subr.bf16.mxu0 %v3983_v0 }
 0x572   : > { %3399 = vmatpush3.bf16.msra.mxu0 %v4566_v5  ;;  %v1894_v5 = vrot.slane %v1893_v31, 1 }
 0x573   : > { %3400 = vmatprep.subr.bf16.mxu0 %v3983_v0 }
 0x576   : > { %3402 = vmatpush3.bf16.msra.mxu0 %v4576_v8  ;;  %v1895_v8 = vadd.f32 %v1894_v5, %v1893_v31 }
 0x577   : > { %3403 = vmatprep.subr.bf16.mxu0 %v3983_v0 }
 0x57a   : > { %3405 = vmatpush3.bf16.msra.mxu0 %v4586_v11  ;;  %v2268_v11 = vld [vmem:[%s4975_s1] sm:$0xff] }
 0x57b   : > { %3406 = vmatprep.subr.bf16.mxu0 %v3983_v0 }
 0x57e   : > { %3408 = vmatpush3.bf16.msra.mxu0 %v4596_v14 }
 0x57f   : > { %3409 = vmatprep.subr.bf16.mxu0 %v3983_v0 }
 0x582   : > { %3411 = vmatpush3.bf16.msra.mxu0 %v4606_v18 }
 0x583   : > { %3412 = vmatprep.subr.bf16.mxu0 %v3983_v0  ;;  %v2269_v0 = vld [vmem:[%s4975_s1 + $0x8] sm:$0xff] }
 0x584   : > { %v3415_v48 = vpack.c.bf16 %v2269_v0, %v2268_v11 }
 0x586   : > { %3414 = vmatpush3.bf16.msra.mxu0 %v4616_v21 }
 0x587   : > { %3135 = vmatprep.subr.mxu0 %v3985_v22 }
 0x589   : > { %3133 = vmatmul.mubr.f32.vlgmr.msra.gmra.mrb[12].mxu0 %v1895_v8 }
 0x58a   : > { %3136 = vmatpush3.msra.mxu0 %v4670_v59  ;;  %3137 = vmatprep.mubr.msk.f32.mxu0 %vm3984_vm3, %v3985_v22 }
 0x58b   : > { %3140 = vmatprep.subr.mxu0 %v3985_v22 }
 0x63c   : > { %v1962_v14 = vpop.f32.mrb[10].mxu0 }
 0x63d   : > { %v1966_v18 = vmul.f32 0.001953125, %v1962_v14  ;;  %v3099_v21 = vpop.f32.mrb[11].mxu0 }
 0x63f   : > { %3138 = vmatmul.mubr.msk.f32.vlgmr.msra.gmra.mrb[14].mxu0 %vm1195_vm4, %v1966_v18  ;;  %v2038_v50 = vmul.f32 %v1966_v18, %v1966_v18 }
 0x640   : > { %3141 = vmatpush3.msra.mxu0 %v4670_v59  ;;  %3142 = vmatprep.mubr.msk.f32.mxu0 %vm3984_vm3, %v3985_v22  ;;  %v3419_v59 = vpack.c.bf16 %v2271_v55, %v2270_v6  ;;  %v2272_v22 = vld [vmem:[%s4975_s1 + $0x20] sm:$0xff]  ;;  %s3894_s1 = scalar_lea.vmem %s3893_s25, 1024 }
 0x641   : > { %3416 = vmatprep.subr.bf16.mxu0 %v3415_v48  ;;  %v3423_v57 = vpack.c.bf16 %v2273_v42, %v2272_v22  ;;  %p3896_p10 = scmp.lt.s32.totalorder %s3894_s1, %s3888_s15 }
 0x643   : > { %p3897_p11 = por %p3896_p10, %p3895_p0 }
 0x645   : > { %p3898_p12 = pnand %p3897_p11, %p3891_p2 }
 0x65c   : > { %v2033_v49 = vpop.f32.mrb[12].mxu0 }
 0x65d   : > { %v2037_v51 = vmul.f32 0.001953125, %v2033_v49  ;;  %v3134_v52 = vpop.f32.mrb[13].mxu0 }
 0x65f   : > { %v2039_v53 = vsub.f32 %v2037_v51, %v2038_v50 }
 0x661   : > { %v2040_v54 = vadd.f32 1e-05, %v2039_v53 }
 0x663   : > { %3608 = vrsqrt.f32 %v2040_v54 }
 0x66d   : > { %v3609_v56 = vpop.eup %3608 }
 0x66e   : > { %3143 = vmatmul.mubr.msk.f32.vlgmr.msra.gmra.mrb[16].mxu0 %vm1195_vm4, %v3609_v56 }
 0x66f   : > { %3418 = vmatpush3.bf16.msra.mxu0 %v3415_v48  ;;  %3161 = vmatprep.mubr.msk.f32.mxu0 %vm710_vm1, %v4440_v16 }
 0x670   : > { %3420 = vmatprep.subr.bf16.mxu0 %v3419_v59 }
 0x673   : > { %3422 = vmatpush3.bf16.msra.mxu0 %v3419_v59 }
 0x674   : > { %3424 = vmatprep.subr.bf16.mxu0 %v3423_v57 }
 0x677   : > { %3426 = vmatpush3.bf16.msra.mxu0 %v3423_v57 }
 0x678   : > { %3428 = vmatprep.subr.bf16.mxu0 %v3427_v60 }
 0x67b   : > { %3430 = vmatpush3.bf16.msra.mxu0 %v3427_v60 }
 0x67e   : > { %3162 = vmatmul.mubr.msk.f32.vlgmr.msra.gmra.mrb[18].mxu0 %vm710_vm1, %v4486_v34 }
 0x67f   : > { %3164 = vmatprep.mubr.msk.f32.mxu0 %vm710_vm1, %v4490_v37  ;;  %v2608_v37 = vld [vmem:[#allocation14] ss:$0 sm:$0xff] }
 0x682   : > { %3165 = vmatmul.mubr.msk.f32.gmra.mrb[20].mxu0 %vm710_vm1, %v4505_v40 }
 0x712   : > { %v2111_v16 = vpop.f32.mrb[14].mxu0 }
 0x713   : > { %v3139_v61 = vpop.f32.mrb[15].mxu0  ;;  %v2191_v62 = vrot.slane %v2111_v16, %v4731_v7  ;;  %v2610_v16 = vld [vmem:[#allocation17] ss:$0 sm:$0xff] }
 0x715   : > { %v2192_v41 = vsub.f32 %v4766_v9, %v2191_v62  ;;  %v2193_v63 = vsub.f32 %v4764_v4, %v2191_v62  ;;  %v2194_v2 = vsub.f32 %v4770_v15, %v2191_v62  ;;  %v2195_v33 = vsub.f32 %v4772_v17, %v2191_v62 }
 0x741   : > { %v2184_v27 = vpop.f32.mrb[16].mxu0 }
 0x742   : > { %v2199_v34 = vrot.slane %v2184_v27, %v4731_v7  ;;  %v3144_v35 = vpop.f32.mrb[17].mxu0 }
 0x744   : > { %v2200_v3 = vmul.f32 %v2199_v34, %v2192_v41  ;;  %v2201_v10 = vmul.f32 %v2199_v34, %v2193_v63  ;;  %v2202_v40 = vmul.f32 %v2199_v34, %v2194_v2  ;;  %v2203_v12 = vmul.f32 %v2199_v34, %v2195_v33 }
 0x746   : > { %v2210_v1 = vmul.f32 %v2608_v37, %v2200_v3  ;;  %v2211_v19 = vmul.f32 %v2608_v37, %v2201_v10  ;;  %v2212_v20 = vmul.f32 %v2608_v37, %v2202_v40  ;;  %v2213_v9 = vmul.f32 %v2608_v37, %v2203_v12 }
 0x748   : > { %v2221_v23 = vadd.f32 %v2609_v13, %v2211_v19  ;;  %v4849_v24 = vadd.f32 %v2609_v13, %v2210_v1  ;;  %v4851_v4 = vadd.f32 %v2609_v13, %v2213_v9  ;;  %v4853_v15 = vadd.f32 %v2609_v13, %v2212_v20 }
 0x74a   : > { %v2229_v17 = vand.u32 2147483647, %v2221_v23  ;;  %v2228_v7 = vand.u32 2147483647, %v4849_v24  ;;  %v2231_v25 = vand.u32 2147483647, %v4851_v4 }
 0x74b   : > { %v2230_v29 = vand.u32 2147483647, %v4853_v15  ;;  %v2225_v51 = vmax.f32 %v2221_v23, 0.0  ;;  %v2224_v54 = vmax.f32 %v4849_v24, 0.0  ;;  %v2227_v56 = vmax.f32 %v4851_v4, 0.0 }
 0x74c   : > { %v2233_v30 = vsub.f32 0.0, %v2229_v17  ;;  %v2232_v32 = vsub.f32 0.0, %v2228_v7  ;;  %v2235_v36 = vsub.f32 0.0, %v2231_v25  ;;  %v2226_v57 = vmax.f32 %v4853_v15, 0.0 }
 0x74d   : > { %v2234_v38 = vsub.f32 0.0, %v2230_v29 }
 0x74e   : > { %v2238_v39 = vmul.f32 1.442695, %v2233_v30  ;;  %v2236_v28 = vmul.f32 1.442695, %v2232_v32  ;;  %v2242_v44 = vmul.f32 1.442695, %v2235_v36 }
 0x74f   : > { %v2240_v45 = vmul.f32 1.442695, %v2234_v38 }
 0x750   : > { %3610 = vpow2.f32 %v2238_v39 }
 0x751   : > { %v3163_v46 = vpop.f32.mrb[18].mxu0  ;;  %3612 = vpow2.f32 %v2236_v28 }
 0x752   : > { %v2349_v26 = vpop.f32.mrb[19].mxu0  ;;  %3614 = vpow2.f32 %v2242_v44  ;;  %v2355_v27 = vadd.f32 %v3163_v46, %v2610_v16 }
 0x753   : > { %3616 = vpow2.f32 %v2240_v45  ;;  %v2350_v34 = vadd.f32 %v2610_v16, %v2349_v26 }
 0x755   : > { %v3166_v47 = vpop.f32.mrb[20].mxu0 }
 0x756   : > { %v2359_v31 = vpop.f32.mrb[21].mxu0  ;;  %v2365_v63 = vadd.f32 %v3166_v47, %v2610_v16 }
 0x757   : > { %v2360_v35 = vadd.f32 %v2610_v16, %v2359_v31 }
 0x75a   : > { %v3611_v5 = vpop.eup %3610 }
 0x75b   : > { %v3613_v8 = vpop.eup %3612  ;;  %v2245_v11 = vadd.f32 1.0, %v3611_v5 }
 0x75c   : > { %v3615_v0 = vpop.eup %3614  ;;  %v2244_v14 = vadd.f32 1.0, %v3613_v8 }
 0x75d   : > { %v3617_v18 = vpop.eup %3616  ;;  %3618 = vlog2.f32 %v2245_v11  ;;  %v2247_v21 = vadd.f32 1.0, %v3615_v0 }
 0x75e   : > { %3620 = vlog2.f32 %v2244_v14  ;;  %v2246_v48 = vadd.f32 1.0, %v3617_v18 }
 0x75f   : > { %3622 = vlog2.f32 %v2247_v21 }
 0x760   : > { %3624 = vlog2.f32 %v2246_v48 }
 0x767   : > { %v3619_v49 = vpop.eup %3618 }
 0x768   : > { %v3621_v50 = vpop.eup %3620  ;;  %v2251_v52 = vmul.f32 0.6931472, %v3619_v49 }
 0x769   : > { %v3623_v53 = vpop.eup %3622  ;;  %v2249_v6 = vmul.f32 0.6931472, %v3621_v50 }
 0x76a   : > { %v3625_v55 = vpop.eup %3624  ;;  %v2257_v59 = vadd.f32 %v2251_v52, %v2225_v51  ;;  %v2255_v22 = vmul.f32 0.6931472, %v3623_v53 }
 0x76b   : > { %v2256_v42 = vadd.f32 %v2249_v6, %v2224_v54  ;;  %v2253_v58 = vmul.f32 0.6931472, %v3625_v55 }
 0x76c   : > { %3626 = vtanh.f32 %v2257_v59  ;;  %v2259_v43 = vadd.f32 %v2255_v22, %v2227_v56 }
 0x76d   : > { %3628 = vtanh.f32 %v2256_v42  ;;  %v2258_v60 = vadd.f32 %v2253_v58, %v2226_v57 }
 0x76e   : > { %3630 = vtanh.f32 %v2259_v43 }
 0x76f   : > { %3632 = vtanh.f32 %v2258_v60 }
 0x776   : > { %v3627_v61 = vpop.eup %3626 }
 0x777   : > { %v3629_v62 = vpop.eup %3628  ;;  %v2265_v41 = vmul.f32 %v3627_v61, %v2221_v23 }
 0x778   : > { %v3631_v2 = vpop.eup %3630  ;;  %v2264_v33 = vmul.f32 %v3629_v62, %v4849_v24 }
 0x779   : > { %v3633_v37 = vpop.eup %3632  ;;  %v2369_v3 = vadd.f32 %v2355_v27, %v2265_v41  ;;  %v2267_v10 = vmul.f32 %v3631_v2, %v4851_v4 }
 0x77a   : > { %v2368_v40 = vadd.f32 %v2350_v34, %v2264_v33  ;;  %v2266_v12 = vmul.f32 %v3633_v37, %v4853_v15 }
 0x77b   : > { %2373 = vst [vmem:[%s650_s28 + $0x8] sm:$0xff] %v2369_v3  ;;  %v2371_v13 = vadd.f32 %v2365_v63, %v2267_v10 }
 0x77c   : > { %2372 = vst [vmem:[%s650_s28] sm:$0xff] %v2368_v40  ;;  %v2370_v1 = vadd.f32 %v2360_v35, %v2266_v12 }
 0x77d   : > { %2375 = vst [vmem:[%s650_s28 + $0x18] sm:$0xff] %v2371_v13 }
 0x77e   : > { %2374 = vst [vmem:[%s650_s28 + $0x10] sm:$0xff] %v2370_v1 }
 0x77f   : > { %3901 = shalt.err (!%p3898_p12)
}
 0x780   : > { %s3902_s28 = scalar_lea.hbm %s4871_s30, 512  ;;  %s3906_s18 = scalar_lea.hbm %s4976_s20, 1024 }
 0x781   : > { %p3903_p8 = scmp.ne.s32.totalorder %s4871_s30, %s3902_s28  ;;  %p3907_p6 = scmp.lt.u32.totalorder %s4871_s30, %s4976_s20 }
 0x782   : > { %p3908_p9 = scmp.lt.u32.totalorder %s3906_s18, %s3902_s28  ;;  %p3910_p13 = scmp.lt.u32.totalorder %s3902_s28, %s4871_s30 }
 0x783   : > { %p3904_p5 = pnand %p3903_p8, %p4977_p1 }
 0x784   : > { %p3909_p4 = por %p3908_p9, %p3907_p6 }
 0x785   : > { %p3905_p7 = pneg %p3904_p5 }
 0x786   : > { %p3911_p3 = por %p3910_p13, %p3909_p4 }
 0x788   : > { %p3912_p2 = pnand %p3911_p3, %p3905_p7 }
 0x78a   : > { %3915 = shalt.err (!%p3912_p2)
}
 0x78b   : > { %s3987_s1 = smov 128   ;;  %s3988_s15 = smov 8  }
 0x78c   : > { %3482 = dma.vmem_to_hbm [thread:$0]  (%p4977_p1), %s4865_s16, 512, %s4871_s30, %s2377_s27, %s3987_s1, %s3987_s1, %s3988_s15  }
 0x78d PF: > { %s2405_s4 = sand.u32 1, %s3958_s21   ;;  %p4978_p0 = scmp.ne.s32.totalorder %s4957_s17, 0 }
 0x78e   : > { %p4979_p10 = scmp.ge.s32.totalorder %s3970_s24, 2  ;;  %s2406_s28 = scalar_lea.sflag [#allocation5], %s2405_s4 }
 0x790   : > { %p3514_p11 = pnand %p4979_p10, %p4978_p0 }
 0x792   : > { %3953 = dma.done.wait (!%p3514_p11), %s2406_s28, 512  }
 0x793   : > { %3955 = vsyncadd (!%p3514_p11), %s2406_s28, 4294966784  ;;  %p33_p12 = scmp.ge.s32.totalorder %s4299_s0, 4   ;;  %s4980_s21 = smov %s3962_s22 }
 0x794   : > { %s4981_s22 = smov %s3966_s23  ;;  %s4982_s23 = smov %s4310_s29 }
 0x795   : > { %s4983_s24 = smov %s4299_s0  ;;  %35 = sbr.rel (!%p33_p12) target bundleno = 19 (0x13), region = 168 }
 0x79c   :  { %2411 = vsyncpa [#allocation4], 1 }
 0x79d   :  { %2413 = vsyncpa [#allocation4 + $0x1], 1 }
 0x79e   :  { %2414 = vsyncpa [#allocation7], 1 }
 0x79f   :  { %2415 = vsyncpa [#allocation10], 1 }
 0x7a0   :  { %2416 = vsyncpa [#allocation13], 1 }
 0x7a1   :  { %2417 = vsyncpa [#allocation16], 1 }
 0x7a2   :  { %2418 = vsyncpa [#allocation5], 1 }
 0x7a3   :  { %2420 = vsyncpa [#allocation5 + $0x1], 1 }

</bundles_post_ra>
